<compile_context>
chip_gen: v7x
topology: tpu7x:2x2x1
jax: 0.10.0
libtpu: 0.0.40
codegen_flags: <defaults>
</compile_context>

<pallas_src>
import jax
import jax.numpy as jnp
from jax.experimental import pallas as pl
from jax.experimental.pallas import tpu as pltpu


def _sigmoid(x):
    # 0.5*(tanh(x/2)+1): EUP tanh, avoids relying on a lax.logistic lowering in Mosaic.
    return 0.5 * (jnp.tanh(0.5 * x) + 1.0)


def _row_tile(rows, elems_per_row, target_bytes=1 << 20):
    """Rows per block: ~1 MiB f32 blocks (safe with double buffering on all TPU gens)."""
    t = max(1, target_bytes // (elems_per_row * 4))
    return min(t, rows)


# ---------------------------------------------------------------------------
# Kernel 1: fused directional average pools
#   pool_h = AdaptiveAvgPool2d((None, 1))  -> mean over W
#   pool_w = AdaptiveAvgPool2d((1, None))  -> mean over H
# ---------------------------------------------------------------------------
def _pool_kernel(x_ref, xh_ref, xw_ref):
    xb = x_ref[...].astype(jnp.float32)                        # (TR, H, W)
    xh_ref[...] = jnp.mean(xb, axis=2).astype(xh_ref.dtype)    # mean over W -> (TR, H)
    xw_ref[...] = jnp.mean(xb, axis=1).astype(xw_ref.dtype)    # mean over H -> (TR, W)


def _pool_hw(xr):
    R, H, W = xr.shape
    tr = _row_tile(R, H * W)
    return pl.pallas_call(
        _pool_kernel,
        out_shape=(jax.ShapeDtypeStruct((R, H), jnp.float32),
                   jax.ShapeDtypeStruct((R, W), jnp.float32)),
        grid=(pl.cdiv(R, tr),),
        in_specs=[pl.BlockSpec((tr, H, W), lambda i: (i, 0, 0))],
        out_specs=(pl.BlockSpec((tr, H), lambda i: (i, 0)),
                   pl.BlockSpec((tr, W), lambda i: (i, 0))),
        compiler_params=pltpu.CompilerParams(dimension_semantics=("parallel",)),
    )(xr)


# ---------------------------------------------------------------------------
# Kernel 2: fused bottleneck
#   branch_main = [conv1x1 + BN, Acon_FReLU, conv1x1 + BN]  then  acon (Acon_FReLU)
#   then the two head 1x1 convs (conv_h / conv_w) evaluated on the full length L;
#   the wrapper slices the h-part / w-part (a 1x1 conv commutes with slicing).
# ---------------------------------------------------------------------------
(_B1, _D1B, _T1P, _T1C, _T1N, _S1, _SH1,
 _B2, _D2B, _T2P, _T2C, _T2N, _S2, _SH2) = range(14)


def _bottleneck_kernel(y_ref, w1_ref, w2_ref, wh_ref, ww_ref, vec_ref, hb_ref,
                       lh_ref, lw_ref):
    f32 = jnp.float32
    y = y_ref[0].astype(f32)                     # (Cin, L)
    L = y.shape[-1]

    # 0/1 shift matrices: (h @ m_prev)[:, j] == h[:, j-1] (0 at j == 0), same for next.
    # The module's depthwise 3x3 runs on a width-1 map with padding=1, so only the
    # centre column of the 3x3 kernel ever sees data -> a 3-tap conv along L.
    r = jax.lax.broadcasted_iota(jnp.int32, (L, L), 0)
    c = jax.lax.broadcasted_iota(jnp.int32, (L, L), 1)
    m_prev = (r == c - 1).astype(f32)
    m_next = (r == c + 1).astype(f32)

    def mix(w, h):                               # 1x1 conv: (Co,Ci,1) x (Ci,L) -> (Co,L)
        return jnp.sum(w.astype(f32) * h[None, :, :], axis=1)

    def acon_frelu(h, tp, tc, tn, db, s, sh):    # Acon_FReLU (stride=1), BN folded
        hp = jnp.dot(h, m_prev, preferred_element_type=f32)
        hn = jnp.dot(h, m_next, preferred_element_type=f32)
        h2 = tp * hp + tc * h + tn * hn + db     # depthwise 3-tap conv (+ folded bn1)
        d = h - h2
        return s * (d * _sigmoid(d) + h2) + sh   # (x1-x2)*sigmoid(x1-x2)+x2, folded bn2

    v = lambda i: vec_ref[i].astype(f32)         # packed per-channel (mip, 1) columns

    h = mix(w1_ref[...], y) + v(_B1)             # conv1x1 (+ folded BN)
    h = acon_frelu(h, v(_T1P), v(_T1C), v(_T1N), v(_D1B), v(_S1), v(_SH1))
    h = mix(w2_ref[...], h) + v(_B2)             # conv1x1 (+ folded BN)
    h = acon_frelu(h, v(_T2P), v(_T2C), v(_T2N), v(_D2B), v(_S2), v(_SH2))

    lh_ref[0] = (mix(wh_ref[...], h) + hb_ref[0].astype(f32)).astype(lh_ref.dtype)
    lw_ref[0] = (mix(ww_ref[...], h) + hb_ref[1].astype(f32)).astype(lw_ref.dtype)


def _bottleneck(y, w1, w2, wh, ww, vecs, hb):
    N, Cin, L = y.shape
    oup = wh.shape[0]
    const3 = lambda shape: pl.BlockSpec(shape, lambda n: (0, 0, 0))
    return pl.pallas_call(
        _bottleneck_kernel,
        out_shape=(jax.ShapeDtypeStruct((N, oup, L), jnp.float32),
                   jax.ShapeDtypeStruct((N, oup, L), jnp.float32)),
        grid=(N,),
        in_specs=[
            pl.BlockSpec((1, Cin, L), lambda n: (n, 0, 0)),
            const3(w1.shape), const3(w2.shape),
            const3(wh.shape), const3(ww.shape),
            const3(vecs.shape), const3(hb.shape),
        ],
        out_specs=(pl.BlockSpec((1, oup, L), lambda n: (n, 0, 0)),
                   pl.BlockSpec((1, oup, L), lambda n: (n, 0, 0))),
        compiler_params=pltpu.CompilerParams(dimension_semantics=("parallel",)),
    )(y, w1, w2, wh, ww, vecs, hb)


# ---------------------------------------------------------------------------
# Kernel 3: fused final apply  out = identity * sigmoid(a_w) * sigmoid(a_h)
# (both sigmoids fused into the full-tensor broadcast multiply)
# ---------------------------------------------------------------------------
def _apply_kernel(x_ref, lh_ref, lw_ref, o_ref):
    a_h = _sigmoid(lh_ref[...].astype(jnp.float32))            # (TR, H, 1)
    a_w = _sigmoid(lw_ref[...].astype(jnp.float32))            # (TR, 1, W)
    o_ref[...] = (x_ref[...].astype(jnp.float32) * a_h * a_w).astype(o_ref.dtype)


def _apply_attention(xr, logit_h, logit_w):
    R, H, W = xr.shape
    tr = _row_tile(R, H * W)
    return pl.pallas_call(
        _apply_kernel,
        out_shape=jax.ShapeDtypeStruct((R, H, W), xr.dtype),
        grid=(pl.cdiv(R, tr),),
        in_specs=[pl.BlockSpec((tr, H, W), lambda i: (i, 0, 0)),
                  pl.BlockSpec((tr, H, 1), lambda i: (i, 0, 0)),
                  pl.BlockSpec((tr, 1, W), lambda i: (i, 0, 0))],
        out_specs=pl.BlockSpec((tr, H, W), lambda i: (i, 0, 0)),
        compiler_params=pltpu.CompilerParams(dimension_semantics=("parallel",)),
    )(xr, logit_h, logit_w)


# ---------------------------------------------------------------------------
# Parameter folding (inference-mode BatchNorm) + full forward wrapper
# ---------------------------------------------------------------------------
def _fold_bn(bn, eps=1e-5):
    gamma, beta, mean, var = bn
    scale = gamma / jnp.sqrt(var + eps)
    return scale, beta - mean * scale


def _fold_acon(p):
    s_a, sh_a = _fold_bn(p['bn1'])
    taps = p['dw_w'][:, 0, :, 1] * s_a[:, None]   # only centre column sees data (width==1)
    dbias = p['dw_b'] * s_a + sh_a
    s_b, sh_b = _fold_bn(p['bn2'])
    return taps, dbias, s_b, sh_b


def coord_att_forward(x, p):
    """Pallas forward pass of CoordAtt (inference-mode BatchNorm, stride=1 Acon path)."""
    N, C, H, W = x.shape
    oup = p['wh'].shape[0]
    assert oup == C, "fused apply kernel assumes oup == inp (required by the elementwise product)"

    # ---- fold parameters (tiny, pure parameter preprocessing) ----
    s1, sh1 = _fold_bn(p['bn1'])
    w1f, b1f = p['w1'] * s1[:, None], p['b1'] * s1 + sh1
    s2, sh2 = _fold_bn(p['bn2'])
    w2f, b2f = p['w2'] * s2[:, None], p['b2'] * s2 + sh2
    t1, d1b, a1s, a1sh = _fold_acon(p['acon1'])
    t2, d2b, a2s, a2sh = _fold_acon(p['acon2'])

    vecs = jnp.stack([b1f, d1b, t1[:, 0], t1[:, 1], t1[:, 2], a1s, a1sh,
                      b2f, d2b, t2[:, 0], t2[:, 1], t2[:, 2], a2s, a2sh],
                     axis=0)[..., None].astype(jnp.float32)                     # (14, mip, 1)
    hb = jnp.stack([p['bh'], p['bw']], axis=0)[..., None].astype(jnp.float32)   # (2, oup, 1)
    w1k = w1f[..., None].astype(jnp.float32)
    w2k = w2f[..., None].astype(jnp.float32)
    whk = p['wh'][..., None].astype(jnp.float32)
    wwk = p['ww'][..., None].astype(jnp.float32)

    # ---- kernel 1: directional pools (single pass over the full tensor) ----
    R = N * C
    xr = x.reshape(R, H, W)
    xh, xw = _pool_hw(xr)                                           # (R, H), (R, W)
    y = jnp.concatenate([xh, xw], axis=-1).reshape(N, C, H + W)     # torch.cat(dim=2)

    # ---- kernel 2: fused bottleneck (branch_main + acon + conv_h/conv_w) ----
    lh_full, lw_full = _bottleneck(y, w1k, w2k, whk, wwk, vecs, hb)  # (N, oup, H+W) x2
    logit_h = lh_full[:, :, :H].reshape(R, H, 1)
    logit_w = lw_full[:, :, H:].reshape(R, 1, W)

    # ---- kernel 3: out = identity * sigmoid(a_w) * sigmoid(a_h) (fused) ----
    out = _apply_attention(xr, logit_h, logit_w)
    return out.reshape(N, C, H, W)


# ---------------------------------------------------------------------------
# Pure-JAX reference (same semantics as the PyTorch module, eval-mode BN)
# ---------------------------------------------------------------------------
def coord_att_reference(x, p, eps=1e-5):
    N, C, H, W = x.shape

    def conv1x1(t, w, b):                         # t (N,Ci,A,B), w (Co,Ci), b (Co,)
        out = jnp.sum(w[None, :, :, None, None] * t[:, None, :, :, :], axis=2)
        return out + b[None, :, None, None]

    def bn(t, bnp):
        g, beta, m, v = bnp
        return (t - m[None, :, None, None]) * (g / jnp.sqrt(v + eps))[None, :, None, None] \
               + beta[None, :, None, None]

    def dwconv3x3(t, w, b):                       # depthwise 3x3, pad 1, stride 1
        L, Wd = t.shape[2], t.shape[3]
        tp = jnp.pad(t, ((0, 0), (0, 0), (1, 1), (1, 1)))
        out = jnp.zeros_like(t)
        for kh in range(3):
            for kw in range(3):
                out = out + w[None, :, 0, kh, kw, None, None] * tp[:, :, kh:kh + L, kw:kw + Wd]
        return out + b[None, :, None, None]

    def acon_frelu(t, pr):
        x2 = bn(dwconv3x3(t, pr['dw_w'], pr['dw_b']), pr['bn1'])
        d = t - x2
        return bn(d * jax.nn.sigmoid(d) + x2, pr['bn2'])

    x_h = jnp.mean(x, axis=3, keepdims=True)                                   # (N,C,H,1)
    x_w = jnp.transpose(jnp.mean(x, axis=2, keepdims=True), (0, 1, 3, 2))      # (N,C,W,1)
    y = jnp.concatenate([x_h, x_w], axis=2)                                    # (N,C,H+W,1)

    y = bn(conv1x1(y, p['w1'], p['b1']), p['bn1'])
    y = acon_frelu(y, p['acon1'])
    y = bn(conv1x1(y, p['w2'], p['b2']), p['bn2'])
    y = acon_frelu(y, p['acon2'])

    y_h, y_w = y[:, :, :H, :], jnp.transpose(y[:, :, H:, :], (0, 1, 3, 2))
    a_h = jax.nn.sigmoid(conv1x1(y_h, p['wh'], p['bh']))                       # (N,oup,H,1)
    a_w = jax.nn.sigmoid(conv1x1(y_w, p['ww'], p['bw']))                       # (N,oup,1,W)
    return x * a_w * a_h


if __name__ == "__main__":
    N, C, H, W = 2, 4, 16, 16            # batch=2, channels=4, spatial=16x16
    inp = oup = C
    mip = max(8, inp // 16)              # reduction=16 -> mip = 8

    keys = iter(jax.random.split(jax.random.PRNGKey(0), 64))

    def rnd(shape, scale=1.0):
        return jax.random.normal(next(keys), shape, dtype=jnp.float32) * scale

    def bn_params(c):
        return (1.0 + 0.1 * rnd((c,)),              # gamma
                0.1 * rnd((c,)),                     # beta
                0.1 * rnd((c,)),                     # running_mean
                0.5 + 0.5 * jnp.abs(rnd((c,))))      # running_var

    x = rnd((N, C, H, W))
    params = {
        'w1': rnd((mip, inp), 0.3), 'b1': rnd((mip,), 0.1), 'bn1': bn_params(mip),
        'acon1': {'dw_w': rnd((mip, 1, 3, 3), 0.3), 'dw_b': rnd((mip,), 0.1),
                  'bn1': bn_params(mip), 'bn2': bn_params(mip)},
        'w2': rnd((mip, mip), 0.3), 'b2': rnd((mip,), 0.1), 'bn2': bn_params(mip),
        'acon2': {'dw_w': rnd((mip, 1, 3, 3), 0.3), 'dw_b': rnd((mip,), 0.1),
                  'bn1': bn_params(mip), 'bn2': bn_params(mip)},
        'wh': rnd((oup, mip), 0.3), 'bh': rnd((oup,), 0.1),
        'ww': rnd((oup, mip), 0.3), 'bw': rnd((oup,), 0.1),
    }

    out = jax.jit(coord_att_forward)(x, params)
    out = jax.block_until_ready(out)

    ref = coord_att_reference(x, params)
    assert out.shape == x.shape and out.dtype == x.dtype
    max_err = float(jnp.max(jnp.abs(out - ref)))
    # Tolerance covers MXU-pass vs pure-VPU accumulation differences in the tiny
    # depthwise-shift matmuls; structural errors would be orders of magnitude larger.
    assert max_err < 1e-2, f"max abs error {max_err}"
    print("KERNEL_OK")
</pallas_src>

<mosaic_0001>
module attributes {stable_mosaic.version = 11 : i64} {
  func.func @_pool_kernel(%arg0: i32, %arg1: memref<8x16x16xf32, #tpu.memory_space<vmem>>, %arg2: memref<8x16xf32, #tpu.memory_space<vmem>>, %arg3: memref<8x16xf32, #tpu.memory_space<vmem>>) attributes {dimension_semantics = [#tpu.dimension_semantics<parallel>], iteration_bounds = array<i64: 1>, scalar_prefetch = 0 : i64, scratch_operands = 0 : i64, tpu.core_type = #tpu.core_type<tc>, window_params = [{transform_indices = @transform_0, window_bounds = array<i64: 8, 16, 16>}, {transform_indices = @transform_1, window_bounds = array<i64: 8, 16>}, {transform_indices = @transform_2, window_bounds = array<i64: 8, 16>}]} {
    %c0 = arith.constant 0 : index
    %c0_0 = arith.constant 0 : index
    %c0_1 = arith.constant 0 : index
    %0 = vector.load %arg1[%c0, %c0_0, %c0_1] : memref<8x16x16xf32, #tpu.memory_space<vmem>>, vector<8x16x16xf32>
    %cst = arith.constant dense<0.000000e+00> : vector<8x16xf32>
    %1 = vector.multi_reduction <add>, %0, %cst [2] : vector<8x16x16xf32> to vector<8x16xf32>
    %cst_2 = arith.constant 1.600000e+01 : f32
    %2 = vector.broadcast %cst_2 : f32 to vector<8x16xf32>
    %3 = arith.divf %1, %2 : vector<8x16xf32>
    %c0_3 = arith.constant 0 : index
    %c0_4 = arith.constant 0 : index
    %4 = vector.load %arg2[%c0_3, %c0_4] : memref<8x16xf32, #tpu.memory_space<vmem>>, vector<8x16xf32>
    tpu.vector_store %arg2[%c0_3, %c0_4], %3 {strides = array<i32>} : memref<8x16xf32, #tpu.memory_space<vmem>>, vector<8x16xf32>,
    %cst_5 = arith.constant dense<0.000000e+00> : vector<8x16xf32>
    %5 = vector.multi_reduction <add>, %0, %cst_5 [1] : vector<8x16x16xf32> to vector<8x16xf32>
    %cst_6 = arith.constant 1.600000e+01 : f32
    %6 = vector.broadcast %cst_6 : f32 to vector<8x16xf32>
    %7 = arith.divf %5, %6 : vector<8x16xf32>
    %c0_7 = arith.constant 0 : index
    %c0_8 = arith.constant 0 : index
    %8 = vector.load %arg3[%c0_7, %c0_8] : memref<8x16xf32, #tpu.memory_space<vmem>>, vector<8x16xf32>
    tpu.vector_store %arg3[%c0_7, %c0_8], %7 {strides = array<i32>} : memref<8x16xf32, #tpu.memory_space<vmem>>, vector<8x16xf32>,
    return
  }
  func.func @transform_0(%arg0: i32) -> (i32, i32, i32) {
    %c0_i32 = arith.constant 0 : i32
    %c0_i32_0 = arith.constant 0 : i32
    %c0_i32_1 = arith.constant 0 : i32
    return %arg0, %c0_i32, %c0_i32_0 : i32, i32, i32
  }
  func.func @transform_1(%arg0: i32) -> (i32, i32) {
    %c0_i32 = arith.constant 0 : i32
    %c0_i32_0 = arith.constant 0 : i32
    return %arg0, %c0_i32 : i32, i32
  }
  func.func @transform_2(%arg0: i32) -> (i32, i32) {
    %c0_i32 = arith.constant 0 : i32
    %c0_i32_0 = arith.constant 0 : i32
    return %arg0, %c0_i32 : i32, i32
  }
}

module attributes {stable_mosaic.version = 11 : i64} {
  func.func @_bottleneck_kernel(%arg0: i32, %arg1: memref<1x4x32xf32, #tpu.memory_space<vmem>>, %arg2: memref<8x4x1xf32, #tpu.memory_space<vmem>>, %arg3: memref<8x8x1xf32, #tpu.memory_space<vmem>>, %arg4: memref<4x8x1xf32, #tpu.memory_space<vmem>>, %arg5: memref<4x8x1xf32, #tpu.memory_space<vmem>>, %arg6: memref<14x8x1xf32, #tpu.memory_space<vmem>>, %arg7: memref<2x4x1xf32, #tpu.memory_space<vmem>>, %arg8: memref<1x4x32xf32, #tpu.memory_space<vmem>>, %arg9: memref<1x4x32xf32, #tpu.memory_space<vmem>>) attributes {dimension_semantics = [#tpu.dimension_semantics<parallel>], iteration_bounds = array<i64: 2>, scalar_prefetch = 0 : i64, scratch_operands = 0 : i64, tpu.core_type = #tpu.core_type<tc>, window_params = [{transform_indices = @transform_0, window_bounds = array<i64: 1, 4, 32>}, {pipeline_mode = #tpu.pipeline_mode<synchronous>, transform_indices = @transform_1, window_bounds = array<i64: 8, 4, 1>}, {pipeline_mode = #tpu.pipeline_mode<synchronous>, transform_indices = @transform_2, window_bounds = array<i64: 8, 8, 1>}, {pipeline_mode = #tpu.pipeline_mode<synchronous>, transform_indices = @transform_3, window_bounds = array<i64: 4, 8, 1>}, {pipeline_mode = #tpu.pipeline_mode<synchronous>, transform_indices = @transform_4, window_bounds = array<i64: 4, 8, 1>}, {pipeline_mode = #tpu.pipeline_mode<synchronous>, transform_indices = @transform_5, window_bounds = array<i64: 14, 8, 1>}, {pipeline_mode = #tpu.pipeline_mode<synchronous>, transform_indices = @transform_6, window_bounds = array<i64: 2, 4, 1>}, {transform_indices = @transform_7, window_bounds = array<i64: 1, 4, 32>}, {transform_indices = @transform_8, window_bounds = array<i64: 1, 4, 32>}]} {
    %c0 = arith.constant 0 : index
    %c0_0 = arith.constant 0 : index
    %c0_1 = arith.constant 0 : index
    %0 = vector.load %arg1[%c0, %c0_0, %c0_1] : memref<1x4x32xf32, #tpu.memory_space<vmem>>, vector<1x4x32xf32>
    %1 = vector.shape_cast %0 : vector<1x4x32xf32> to vector<4x32xf32>
    %2 = tpu.iota {dimensions = array<i32: 0>} : vector<32x32xi32>
    %3 = tpu.iota {dimensions = array<i32: 1>} : vector<32x32xi32>
    %c1_i32 = arith.constant 1 : i32
    %4 = vector.broadcast %c1_i32 : i32 to vector<32x32xi32>
    %5 = arith.subi %3, %4 : vector<32x32xi32>
    %6 = arith.cmpi eq, %2, %5 : vector<32x32xi32>
    %7 = arith.extui %6 : vector<32x32xi1> to vector<32x32xi32>
    %8 = arith.sitofp %7 : vector<32x32xi32> to vector<32x32xf32>
    %c1_i32_2 = arith.constant 1 : i32
    %9 = vector.broadcast %c1_i32_2 : i32 to vector<32x32xi32>
    %10 = arith.addi %3, %9 : vector<32x32xi32>
    %11 = arith.cmpi eq, %2, %10 : vector<32x32xi32>
    %12 = arith.extui %11 : vector<32x32xi1> to vector<32x32xi32>
    %13 = arith.sitofp %12 : vector<32x32xi32> to vector<32x32xf32>
    %c0_3 = arith.constant 0 : index
    %c0_4 = arith.constant 0 : index
    %c0_5 = arith.constant 0 : index
    %14 = vector.load %arg2[%c0_3, %c0_4, %c0_5] : memref<8x4x1xf32, #tpu.memory_space<vmem>>, vector<8x4x1xf32>
    %15 = vector.shape_cast %1 : vector<4x32xf32> to vector<1x4x32xf32>
    %16 = vector.broadcast %14 : vector<8x4x1xf32> to vector<8x4x32xf32>
    %17 = vector.broadcast %15 : vector<1x4x32xf32> to vector<8x4x32xf32>
    %18 = arith.mulf %16, %17 : vector<8x4x32xf32>
    %cst = arith.constant dense<0.000000e+00> : vector<8x32xf32>
    %19 = vector.multi_reduction <add>, %18, %cst [1] : vector<8x4x32xf32> to vector<8x32xf32>
    %c0_6 = arith.constant 0 : index
    %c0_7 = arith.constant 0 : index
    %c0_8 = arith.constant 0 : index
    %20 = vector.load %arg6[%c0_6, %c0_7, %c0_8] : memref<14x8x1xf32, #tpu.memory_space<vmem>>, vector<1x8x1xf32>
    %21 = vector.shape_cast %20 : vector<1x8x1xf32> to vector<8x1xf32>
    %22 = vector.broadcast %21 : vector<8x1xf32> to vector<8x32xf32>
    %23 = arith.addf %19, %22 : vector<8x32xf32>
    %c2 = arith.constant 2 : index
    %c0_9 = arith.constant 0 : index
    %c0_10 = arith.constant 0 : index
    %24 = vector.load %arg6[%c2, %c0_9, %c0_10] : memref<14x8x1xf32, #tpu.memory_space<vmem>>, vector<1x8x1xf32>
    %25 = vector.shape_cast %24 : vector<1x8x1xf32> to vector<8x1xf32>
    %c3 = arith.constant 3 : index
    %c0_11 = arith.constant 0 : index
    %c0_12 = arith.constant 0 : index
    %26 = vector.load %arg6[%c3, %c0_11, %c0_12] : memref<14x8x1xf32, #tpu.memory_space<vmem>>, vector<1x8x1xf32>
    %27 = vector.shape_cast %26 : vector<1x8x1xf32> to vector<8x1xf32>
    %c4 = arith.constant 4 : index
    %c0_13 = arith.constant 0 : index
    %c0_14 = arith.constant 0 : index
    %28 = vector.load %arg6[%c4, %c0_13, %c0_14] : memref<14x8x1xf32, #tpu.memory_space<vmem>>, vector<1x8x1xf32>
    %29 = vector.shape_cast %28 : vector<1x8x1xf32> to vector<8x1xf32>
    %c1 = arith.constant 1 : index
    %c0_15 = arith.constant 0 : index
    %c0_16 = arith.constant 0 : index
    %30 = vector.load %arg6[%c1, %c0_15, %c0_16] : memref<14x8x1xf32, #tpu.memory_space<vmem>>, vector<1x8x1xf32>
    %31 = vector.shape_cast %30 : vector<1x8x1xf32> to vector<8x1xf32>
    %c5 = arith.constant 5 : index
    %c0_17 = arith.constant 0 : index
    %c0_18 = arith.constant 0 : index
    %32 = vector.load %arg6[%c5, %c0_17, %c0_18] : memref<14x8x1xf32, #tpu.memory_space<vmem>>, vector<1x8x1xf32>
    %33 = vector.shape_cast %32 : vector<1x8x1xf32> to vector<8x1xf32>
    %c6 = arith.constant 6 : index
    %c0_19 = arith.constant 0 : index
    %c0_20 = arith.constant 0 : index
    %34 = vector.load %arg6[%c6, %c0_19, %c0_20] : memref<14x8x1xf32, #tpu.memory_space<vmem>>, vector<1x8x1xf32>
    %35 = vector.shape_cast %34 : vector<1x8x1xf32> to vector<8x1xf32>
    %cst_21 = arith.constant dense<0.000000e+00> : vector<8x32xf32>
    %36 = tpu.matmul %23, %8, %cst_21 {dimension_numbers = #tpu.dot_dimension_numbers<[1], [0], [0], [1], [0, 0, 1, 1], [], []>} : vector<8x32xf32>, vector<32x32xf32>, vector<8x32xf32> -> vector<8x32xf32>
    %cst_22 = arith.constant dense<0.000000e+00> : vector<8x32xf32>
    %37 = tpu.matmul %23, %13, %cst_22 {dimension_numbers = #tpu.dot_dimension_numbers<[1], [0], [0], [1], [0, 0, 1, 1], [], []>} : vector<8x32xf32>, vector<32x32xf32>, vector<8x32xf32> -> vector<8x32xf32>
    %38 = vector.broadcast %25 : vector<8x1xf32> to vector<8x32xf32>
    %39 = arith.mulf %38, %36 : vector<8x32xf32>
    %40 = vector.broadcast %27 : vector<8x1xf32> to vector<8x32xf32>
    %41 = arith.mulf %40, %23 : vector<8x32xf32>
    %42 = arith.addf %39, %41 : vector<8x32xf32>
    %43 = vector.broadcast %29 : vector<8x1xf32> to vector<8x32xf32>
    %44 = arith.mulf %43, %37 : vector<8x32xf32>
    %45 = arith.addf %42, %44 : vector<8x32xf32>
    %46 = vector.broadcast %31 : vector<8x1xf32> to vector<8x32xf32>
    %47 = arith.addf %45, %46 : vector<8x32xf32>
    %48 = arith.subf %23, %47 : vector<8x32xf32>
    %cst_23 = arith.constant 5.000000e-01 : f32
    %49 = vector.broadcast %cst_23 : f32 to vector<8x32xf32>
    %50 = arith.mulf %49, %48 : vector<8x32xf32>
    %51 = math.tanh %50 : vector<8x32xf32>
    %cst_24 = arith.constant 1.000000e+00 : f32
    %52 = vector.broadcast %cst_24 : f32 to vector<8x32xf32>
    %53 = arith.addf %51, %52 : vector<8x32xf32>
    %cst_25 = arith.constant 5.000000e-01 : f32
    %54 = vector.broadcast %cst_25 : f32 to vector<8x32xf32>
    %55 = arith.mulf %54, %53 : vector<8x32xf32>
    %56 = arith.mulf %48, %55 : vector<8x32xf32>
    %57 = arith.addf %56, %47 : vector<8x32xf32>
    %58 = vector.broadcast %33 : vector<8x1xf32> to vector<8x32xf32>
    %59 = arith.mulf %58, %57 : vector<8x32xf32>
    %60 = vector.broadcast %35 : vector<8x1xf32> to vector<8x32xf32>
    %61 = arith.addf %59, %60 : vector<8x32xf32>
    %c0_26 = arith.constant 0 : index
    %c0_27 = arith.constant 0 : index
    %c0_28 = arith.constant 0 : index
    %62 = vector.load %arg3[%c0_26, %c0_27, %c0_28] : memref<8x8x1xf32, #tpu.memory_space<vmem>>, vector<8x8x1xf32>
    %63 = vector.shape_cast %61 : vector<8x32xf32> to vector<1x8x32xf32>
    %64 = vector.broadcast %62 : vector<8x8x1xf32> to vector<8x8x32xf32>
    %65 = vector.broadcast %63 : vector<1x8x32xf32> to vector<8x8x32xf32>
    %66 = arith.mulf %64, %65 : vector<8x8x32xf32>
    %cst_29 = arith.constant dense<0.000000e+00> : vector<8x32xf32>
    %67 = vector.multi_reduction <add>, %66, %cst_29 [1] : vector<8x8x32xf32> to vector<8x32xf32>
    %c7 = arith.constant 7 : index
    %c0_30 = arith.constant 0 : index
    %c0_31 = arith.constant 0 : index
    %68 = vector.load %arg6[%c7, %c0_30, %c0_31] : memref<14x8x1xf32, #tpu.memory_space<vmem>>, vector<1x8x1xf32>
    %69 = vector.shape_cast %68 : vector<1x8x1xf32> to vector<8x1xf32>
    %70 = vector.broadcast %69 : vector<8x1xf32> to vector<8x32xf32>
    %71 = arith.addf %67, %70 : vector<8x32xf32>
    %c9 = arith.constant 9 : index
    %c0_32 = arith.constant 0 : index
    %c0_33 = arith.constant 0 : index
    %72 = vector.load %arg6[%c9, %c0_32, %c0_33] : memref<14x8x1xf32, #tpu.memory_space<vmem>>, vector<1x8x1xf32>
    %73 = vector.shape_cast %72 : vector<1x8x1xf32> to vector<8x1xf32>
    %c10 = arith.constant 10 : index
    %c0_34 = arith.constant 0 : index
    %c0_35 = arith.constant 0 : index
    %74 = vector.load %arg6[%c10, %c0_34, %c0_35] : memref<14x8x1xf32, #tpu.memory_space<vmem>>, vector<1x8x1xf32>
    %75 = vector.shape_cast %74 : vector<1x8x1xf32> to vector<8x1xf32>
    %c11 = arith.constant 11 : index
    %c0_36 = arith.constant 0 : index
    %c0_37 = arith.constant 0 : index
    %76 = vector.load %arg6[%c11, %c0_36, %c0_37] : memref<14x8x1xf32, #tpu.memory_space<vmem>>, vector<1x8x1xf32>
    %77 = vector.shape_cast %76 : vector<1x8x1xf32> to vector<8x1xf32>
    %c8 = arith.constant 8 : index
    %c0_38 = arith.constant 0 : index
    %c0_39 = arith.constant 0 : index
    %78 = vector.load %arg6[%c8, %c0_38, %c0_39] : memref<14x8x1xf32, #tpu.memory_space<vmem>>, vector<1x8x1xf32>
    %79 = vector.shape_cast %78 : vector<1x8x1xf32> to vector<8x1xf32>
    %c12 = arith.constant 12 : index
    %c0_40 = arith.constant 0 : index
    %c0_41 = arith.constant 0 : index
    %80 = vector.load %arg6[%c12, %c0_40, %c0_41] : memref<14x8x1xf32, #tpu.memory_space<vmem>>, vector<1x8x1xf32>
    %81 = vector.shape_cast %80 : vector<1x8x1xf32> to vector<8x1xf32>
    %c13 = arith.constant 13 : index
    %c0_42 = arith.constant 0 : index
    %c0_43 = arith.constant 0 : index
    %82 = vector.load %arg6[%c13, %c0_42, %c0_43] : memref<14x8x1xf32, #tpu.memory_space<vmem>>, vector<1x8x1xf32>
    %83 = vector.shape_cast %82 : vector<1x8x1xf32> to vector<8x1xf32>
    %cst_44 = arith.constant dense<0.000000e+00> : vector<8x32xf32>
    %84 = tpu.matmul %71, %8, %cst_44 {dimension_numbers = #tpu.dot_dimension_numbers<[1], [0], [0], [1], [0, 0, 1, 1], [], []>} : vector<8x32xf32>, vector<32x32xf32>, vector<8x32xf32> -> vector<8x32xf32>
    %cst_45 = arith.constant dense<0.000000e+00> : vector<8x32xf32>
    %85 = tpu.matmul %71, %13, %cst_45 {dimension_numbers = #tpu.dot_dimension_numbers<[1], [0], [0], [1], [0, 0, 1, 1], [], []>} : vector<8x32xf32>, vector<32x32xf32>, vector<8x32xf32> -> vector<8x32xf32>
    %86 = vector.broadcast %73 : vector<8x1xf32> to vector<8x32xf32>
    %87 = arith.mulf %86, %84 : vector<8x32xf32>
    %88 = vector.broadcast %75 : vector<8x1xf32> to vector<8x32xf32>
    %89 = arith.mulf %88, %71 : vector<8x32xf32>
    %90 = arith.addf %87, %89 : vector<8x32xf32>
    %91 = vector.broadcast %77 : vector<8x1xf32> to vector<8x32xf32>
    %92 = arith.mulf %91, %85 : vector<8x32xf32>
    %93 = arith.addf %90, %92 : vector<8x32xf32>
    %94 = vector.broadcast %79 : vector<8x1xf32> to vector<8x32xf32>
    %95 = arith.addf %93, %94 : vector<8x32xf32>
    %96 = arith.subf %71, %95 : vector<8x32xf32>
    %cst_46 = arith.constant 5.000000e-01 : f32
    %97 = vector.broadcast %cst_46 : f32 to vector<8x32xf32>
    %98 = arith.mulf %97, %96 : vector<8x32xf32>
    %99 = math.tanh %98 : vector<8x32xf32>
    %cst_47 = arith.constant 1.000000e+00 : f32
    %100 = vector.broadcast %cst_47 : f32 to vector<8x32xf32>
    %101 = arith.addf %99, %100 : vector<8x32xf32>
    %cst_48 = arith.constant 5.000000e-01 : f32
    %102 = vector.broadcast %cst_48 : f32 to vector<8x32xf32>
    %103 = arith.mulf %102, %101 : vector<8x32xf32>
    %104 = arith.mulf %96, %103 : vector<8x32xf32>
    %105 = arith.addf %104, %95 : vector<8x32xf32>
    %106 = vector.broadcast %81 : vector<8x1xf32> to vector<8x32xf32>
    %107 = arith.mulf %106, %105 : vector<8x32xf32>
    %108 = vector.broadcast %83 : vector<8x1xf32> to vector<8x32xf32>
    %109 = arith.addf %107, %108 : vector<8x32xf32>
    %c0_49 = arith.constant 0 : index
    %c0_50 = arith.constant 0 : index
    %c0_51 = arith.constant 0 : index
    %110 = vector.load %arg4[%c0_49, %c0_50, %c0_51] : memref<4x8x1xf32, #tpu.memory_space<vmem>>, vector<4x8x1xf32>
    %111 = vector.shape_cast %109 : vector<8x32xf32> to vector<1x8x32xf32>
    %112 = vector.broadcast %110 : vector<4x8x1xf32> to vector<4x8x32xf32>
    %113 = vector.broadcast %111 : vector<1x8x32xf32> to vector<4x8x32xf32>
    %114 = arith.mulf %112, %113 : vector<4x8x32xf32>
    %cst_52 = arith.constant dense<0.000000e+00> : vector<4x32xf32>
    %115 = vector.multi_reduction <add>, %114, %cst_52 [1] : vector<4x8x32xf32> to vector<4x32xf32>
    %c0_53 = arith.constant 0 : index
    %c0_54 = arith.constant 0 : index
    %c0_55 = arith.constant 0 : index
    %116 = vector.load %arg7[%c0_53, %c0_54, %c0_55] : memref<2x4x1xf32, #tpu.memory_space<vmem>>, vector<1x4x1xf32>
    %117 = vector.shape_cast %116 : vector<1x4x1xf32> to vector<4x1xf32>
    %118 = vector.broadcast %117 : vector<4x1xf32> to vector<4x32xf32>
    %119 = arith.addf %115, %118 : vector<4x32xf32>
    %c0_56 = arith.constant 0 : index
    %c0_57 = arith.constant 0 : index
    %c0_58 = arith.constant 0 : index
    %120 = vector.load %arg8[%c0_56, %c0_57, %c0_58] : memref<1x4x32xf32, #tpu.memory_space<vmem>>, vector<1x4x32xf32>
    %121 = vector.shape_cast %120 : vector<1x4x32xf32> to vector<4x32xf32>
    %122 = vector.shape_cast %119 : vector<4x32xf32> to vector<1x4x32xf32>
    tpu.vector_store %arg8[%c0_56, %c0_57, %c0_58], %122 {strides = array<i32>} : memref<1x4x32xf32, #tpu.memory_space<vmem>>, vector<1x4x32xf32>,
    %c0_59 = arith.constant 0 : index
    %c0_60 = arith.constant 0 : index
    %c0_61 = arith.constant 0 : index
    %123 = vector.load %arg5[%c0_59, %c0_60, %c0_61] : memref<4x8x1xf32, #tpu.memory_space<vmem>>, vector<4x8x1xf32>
    %124 = vector.shape_cast %109 : vector<8x32xf32> to vector<1x8x32xf32>
    %125 = vector.broadcast %123 : vector<4x8x1xf32> to vector<4x8x32xf32>
    %126 = vector.broadcast %124 : vector<1x8x32xf32> to vector<4x8x32xf32>
    %127 = arith.mulf %125, %126 : vector<4x8x32xf32>
    %cst_62 = arith.constant dense<0.000000e+00> : vector<4x32xf32>
    %128 = vector.multi_reduction <add>, %127, %cst_62 [1] : vector<4x8x32xf32> to vector<4x32xf32>
    %c1_63 = arith.constant 1 : index
    %c0_64 = arith.constant 0 : index
    %c0_65 = arith.constant 0 : index
    %129 = vector.load %arg7[%c1_63, %c0_64, %c0_65] : memref<2x4x1xf32, #tpu.memory_space<vmem>>, vector<1x4x1xf32>
    %130 = vector.shape_cast %129 : vector<1x4x1xf32> to vector<4x1xf32>
    %131 = vector.broadcast %130 : vector<4x1xf32> to vector<4x32xf32>
    %132 = arith.addf %128, %131 : vector<4x32xf32>
    %c0_66 = arith.constant 0 : index
    %c0_67 = arith.constant 0 : index
    %c0_68 = arith.constant 0 : index
    %133 = vector.load %arg9[%c0_66, %c0_67, %c0_68] : memref<1x4x32xf32, #tpu.memory_space<vmem>>, vector<1x4x32xf32>
    %134 = vector.shape_cast %133 : vector<1x4x32xf32> to vector<4x32xf32>
    %135 = vector.shape_cast %132 : vector<4x32xf32> to vector<1x4x32xf32>
    tpu.vector_store %arg9[%c0_66, %c0_67, %c0_68], %135 {strides = array<i32>} : memref<1x4x32xf32, #tpu.memory_space<vmem>>, vector<1x4x32xf32>,
    return
  }
  func.func @transform_0(%arg0: i32) -> (i32, i32, i32) {
    %c0_i32 = arith.constant 0 : i32
    %c0_i32_0 = arith.constant 0 : i32
    %c0_i32_1 = arith.constant 0 : i32
    return %arg0, %c0_i32, %c0_i32_0 : i32, i32, i32
  }
  func.func @transform_1(%arg0: i32) -> (i32, i32, i32) {
    %c0_i32 = arith.constant 0 : i32
    %c0_i32_0 = arith.constant 0 : i32
    %c0_i32_1 = arith.constant 0 : i32
    %c0_i32_2 = arith.constant 0 : i32
    return %c0_i32, %c0_i32_0, %c0_i32_1 : i32, i32, i32
  }
  func.func @transform_2(%arg0: i32) -> (i32, i32, i32) {
    %c0_i32 = arith.constant 0 : i32
    %c0_i32_0 = arith.constant 0 : i32
    %c0_i32_1 = arith.constant 0 : i32
    %c0_i32_2 = arith.constant 0 : i32
    return %c0_i32, %c0_i32_0, %c0_i32_1 : i32, i32, i32
  }
  func.func @transform_3(%arg0: i32) -> (i32, i32, i32) {
    %c0_i32 = arith.constant 0 : i32
    %c0_i32_0 = arith.constant 0 : i32
    %c0_i32_1 = arith.constant 0 : i32
    %c0_i32_2 = arith.constant 0 : i32
    return %c0_i32, %c0_i32_0, %c0_i32_1 : i32, i32, i32
  }
  func.func @transform_4(%arg0: i32) -> (i32, i32, i32) {
    %c0_i32 = arith.constant 0 : i32
    %c0_i32_0 = arith.constant 0 : i32
    %c0_i32_1 = arith.constant 0 : i32
    %c0_i32_2 = arith.constant 0 : i32
    return %c0_i32, %c0_i32_0, %c0_i32_1 : i32, i32, i32
  }
  func.func @transform_5(%arg0: i32) -> (i32, i32, i32) {
    %c0_i32 = arith.constant 0 : i32
    %c0_i32_0 = arith.constant 0 : i32
    %c0_i32_1 = arith.constant 0 : i32
    %c0_i32_2 = arith.constant 0 : i32
    return %c0_i32, %c0_i32_0, %c0_i32_1 : i32, i32, i32
  }
  func.func @transform_6(%arg0: i32) -> (i32, i32, i32) {
    %c0_i32 = arith.constant 0 : i32
    %c0_i32_0 = arith.constant 0 : i32
    %c0_i32_1 = arith.constant 0 : i32
    %c0_i32_2 = arith.constant 0 : i32
    return %c0_i32, %c0_i32_0, %c0_i32_1 : i32, i32, i32
  }
  func.func @transform_7(%arg0: i32) -> (i32, i32, i32) {
    %c0_i32 = arith.constant 0 : i32
    %c0_i32_0 = arith.constant 0 : i32
    %c0_i32_1 = arith.constant 0 : i32
    return %arg0, %c0_i32, %c0_i32_0 : i32, i32, i32
  }
  func.func @transform_8(%arg0: i32) -> (i32, i32, i32) {
    %c0_i32 = arith.constant 0 : i32
    %c0_i32_0 = arith.constant 0 : i32
    %c0_i32_1 = arith.constant 0 : i32
    return %arg0, %c0_i32, %c0_i32_0 : i32, i32, i32
  }
}

module attributes {stable_mosaic.version = 11 : i64} {
  func.func @_apply_kernel(%arg0: i32, %arg1: memref<8x16x16xf32, #tpu.memory_space<vmem>>, %arg2: memref<8x16x1xf32, #tpu.memory_space<vmem>>, %arg3: memref<8x1x16xf32, #tpu.memory_space<vmem>>, %arg4: memref<8x16x16xf32, #tpu.memory_space<vmem>>) attributes {dimension_semantics = [#tpu.dimension_semantics<parallel>], iteration_bounds = array<i64: 1>, scalar_prefetch = 0 : i64, scratch_operands = 0 : i64, tpu.core_type = #tpu.core_type<tc>, window_params = [{transform_indices = @transform_0, window_bounds = array<i64: 8, 16, 16>}, {transform_indices = @transform_1, window_bounds = array<i64: 8, 16, 1>}, {transform_indices = @transform_2, window_bounds = array<i64: 8, 1, 16>}, {transform_indices = @transform_3, window_bounds = array<i64: 8, 16, 16>}]} {
    %c0 = arith.constant 0 : index
    %c0_0 = arith.constant 0 : index
    %c0_1 = arith.constant 0 : index
    %0 = vector.load %arg2[%c0, %c0_0, %c0_1] : memref<8x16x1xf32, #tpu.memory_space<vmem>>, vector<8x16x1xf32>
    %cst = arith.constant 5.000000e-01 : f32
    %1 = vector.broadcast %cst : f32 to vector<8x16x1xf32>
    %2 = arith.mulf %1, %0 : vector<8x16x1xf32>
    %3 = math.tanh %2 : vector<8x16x1xf32>
    %cst_2 = arith.constant 1.000000e+00 : f32
    %4 = vector.broadcast %cst_2 : f32 to vector<8x16x1xf32>
    %5 = arith.addf %3, %4 : vector<8x16x1xf32>
    %cst_3 = arith.constant 5.000000e-01 : f32
    %6 = vector.broadcast %cst_3 : f32 to vector<8x16x1xf32>
    %7 = arith.mulf %6, %5 : vector<8x16x1xf32>
    %c0_4 = arith.constant 0 : index
    %c0_5 = arith.constant 0 : index
    %c0_6 = arith.constant 0 : index
    %8 = vector.load %arg3[%c0_4, %c0_5, %c0_6] : memref<8x1x16xf32, #tpu.memory_space<vmem>>, vector<8x1x16xf32>
    %cst_7 = arith.constant 5.000000e-01 : f32
    %9 = vector.broadcast %cst_7 : f32 to vector<8x1x16xf32>
    %10 = arith.mulf %9, %8 : vector<8x1x16xf32>
    %11 = math.tanh %10 : vector<8x1x16xf32>
    %cst_8 = arith.constant 1.000000e+00 : f32
    %12 = vector.broadcast %cst_8 : f32 to vector<8x1x16xf32>
    %13 = arith.addf %11, %12 : vector<8x1x16xf32>
    %cst_9 = arith.constant 5.000000e-01 : f32
    %14 = vector.broadcast %cst_9 : f32 to vector<8x1x16xf32>
    %15 = arith.mulf %14, %13 : vector<8x1x16xf32>
    %c0_10 = arith.constant 0 : index
    %c0_11 = arith.constant 0 : index
    %c0_12 = arith.constant 0 : index
    %16 = vector.load %arg1[%c0_10, %c0_11, %c0_12] : memref<8x16x16xf32, #tpu.memory_space<vmem>>, vector<8x16x16xf32>
    %17 = vector.broadcast %7 : vector<8x16x1xf32> to vector<8x16x16xf32>
    %18 = arith.mulf %16, %17 : vector<8x16x16xf32>
    %19 = vector.broadcast %15 : vector<8x1x16xf32> to vector<8x16x16xf32>
    %20 = arith.mulf %18, %19 : vector<8x16x16xf32>
    %c0_13 = arith.constant 0 : index
    %c0_14 = arith.constant 0 : index
    %c0_15 = arith.constant 0 : index
    %21 = vector.load %arg4[%c0_13, %c0_14, %c0_15] : memref<8x16x16xf32, #tpu.memory_space<vmem>>, vector<8x16x16xf32>
    tpu.vector_store %arg4[%c0_13, %c0_14, %c0_15], %20 {strides = array<i32>} : memref<8x16x16xf32, #tpu.memory_space<vmem>>, vector<8x16x16xf32>,
    return
  }
  func.func @transform_0(%arg0: i32) -> (i32, i32, i32) {
    %c0_i32 = arith.constant 0 : i32
    %c0_i32_0 = arith.constant 0 : i32
    %c0_i32_1 = arith.constant 0 : i32
    return %arg0, %c0_i32, %c0_i32_0 : i32, i32, i32
  }
  func.func @transform_1(%arg0: i32) -> (i32, i32, i32) {
    %c0_i32 = arith.constant 0 : i32
    %c0_i32_0 = arith.constant 0 : i32
    %c0_i32_1 = arith.constant 0 : i32
    return %arg0, %c0_i32, %c0_i32_0 : i32, i32, i32
  }
  func.func @transform_2(%arg0: i32) -> (i32, i32, i32) {
    %c0_i32 = arith.constant 0 : i32
    %c0_i32_0 = arith.constant 0 : i32
    %c0_i32_1 = arith.constant 0 : i32
    return %arg0, %c0_i32, %c0_i32_0 : i32, i32, i32
  }
  func.func @transform_3(%arg0: i32) -> (i32, i32, i32) {
    %c0_i32 = arith.constant 0 : i32
    %c0_i32_0 = arith.constant 0 : i32
    %c0_i32_1 = arith.constant 0 : i32
    return %arg0, %c0_i32, %c0_i32_0 : i32, i32, i32
  }
}

</mosaic_0001>

<bundles_post_ra>
// kernel: coord_att_forward.3
= control target key start
LH: loop header
LB: loop body
LE: loop exit
PB: predicated region body
PF: predicated region fallthrough
CT: control target
= control target key end

     0   :  { %vm26_vm0 = vcmask 130048   ;;  %vm184_vm1 = vcmask 1041409   ;;  %vm186_vm2 = vcmask 1042434   ;;  %vm188_vm3 = vcmask 1043459   ;;  %s398_s0 = inlined_call_operand.vmem [shape: f32[8,16,16], index: 0, kind: input, shape index: {}]   ;;  %s399_s2 = inlined_call_operand.vmem [shape: f32[8,16], index: 2, kind: output, shape index: {1}]   ;;  %s400_s1 = inlined_call_operand.vmem [shape: f32[8,16], index: 1, kind: output, shape index: {0}]  }
   0x1   :  { %v12_v0 = vld [vmem:[%s398_s0 + $0x10] sm:$0xff]  ;;  %v10_v1 = vld [vmem:[%s398_s0] sm:$0xff]  ;;  %v13_v2 = vld [vmem:[%s398_s0 + $0x18] sm:$0xff]  ;;  %vm190_vm4 = vcmask 1044484   ;;  %vm192_vm5 = vcmask 1045509   ;;  %vm194_vm6 = vcmask 1046534  }
   0x2   :  { %v33_v3 = vsel %vm26_vm0, %v12_v0, 0.0  ;;  %v27_v4 = vsel %vm26_vm0, %v10_v1, 0.0  ;;  %v36_v5 = vsel %vm26_vm0, %v13_v2, 0.0  ;;  %v11_v6 = vld [vmem:[%s398_s0 + $0x8] sm:$0xff]  ;;  %v14_v8 = vld [vmem:[%s398_s0 + $0x20] sm:$0xff]  ;;  %v17_v13 = vld [vmem:[%s398_s0 + $0x38] sm:$0xff] }
   0x3   :  { %v15_v7 = vld [vmem:[%s398_s0 + $0x28] sm:$0xff]  ;;  %34 = vadd.xlane.f32.xlu1 %v33_v3  ;;  %28 = vadd.xlane.f32.xlu0 %v27_v4  ;;  %v207_v9 = vadd.f32 %v36_v5, %v33_v3  ;;  %v30_v10 = vsel %vm26_vm0, %v11_v6, 0.0  ;;  %v39_v12 = vsel %vm26_vm0, %v14_v8, 0.0  ;;  %v16_v14 = vld [vmem:[%s398_s0 + $0x30] sm:$0xff]  ;;  %v48_v18 = vsel %vm26_vm0, %v17_v13, 0.0  ;;  %v18_v21 = vld [vmem:[%s398_s0 + $0x40] sm:$0xff] }
   0x4   :  { %v42_v11 = vsel %vm26_vm0, %v15_v7, 0.0  ;;  %v200_v15 = vadd.f32 %v30_v10, %v27_v4  ;;  %v45_v19 = vsel %vm26_vm0, %v16_v14, 0.0  ;;  %v19_v20 = vld [vmem:[%s398_s0 + $0x48] sm:$0xff]  ;;  %v51_v28 = vsel %vm26_vm0, %v18_v21, 0.0  ;;  %v21_v29 = vld [vmem:[%s398_s0 + $0x58] sm:$0xff]  ;;  %v20_v30 = vld [vmem:[%s398_s0 + $0x50] sm:$0xff] }
   0x5   :  { %v214_v16 = vadd.f32 %v42_v11, %v39_v12  ;;  %v208_v17 = vrot.slane %v207_v9, 4  ;;  %v221_v23 = vadd.f32 %v48_v18, %v45_v19  ;;  %v54_v27 = vsel %vm26_vm0, %v19_v20, 0.0  ;;  %v23_v36 = vld [vmem:[%s398_s0 + $0x68] sm:$0xff]  ;;  %v22_v37 = vld [vmem:[%s398_s0 + $0x60] sm:$0xff]  ;;  %v25_v45 = vld [vmem:[%s398_s0 + $0x78] sm:$0xff] }
   0x6   :  { %v201_v22 = vrot.slane %v200_v15, 4  ;;  %v228_v31 = vadd.f32 %v54_v27, %v51_v28  ;;  %v60_v34 = vsel %vm26_vm0, %v21_v29, 0.0  ;;  %v57_v35 = vsel %vm26_vm0, %v20_v30, 0.0  ;;  %v24_v46 = vld [vmem:[%s398_s0 + $0x70] sm:$0xff] }
   0x7   :  { %37 = vadd.xlane.f32.xlu1 %v36_v5  ;;  %31 = vadd.xlane.f32.xlu0 %v30_v10  ;;  %v215_v24 = vrot.slane %v214_v16, 4  ;;  %v209_v25 = vadd.f32 %v208_v17, %v207_v9  ;;  %v222_v32 = vrot.slane %v221_v23, 4  ;;  %v235_v40 = vadd.f32 %v60_v34, %v57_v35 }
   0x8   :  { %v202_v26 = vadd.f32 %v201_v22, %v200_v15  ;;  %v229_v41 = vrot.slane %v228_v31, 4  ;;  %v66_v43 = vsel %vm26_vm0, %v23_v36, 0.0  ;;  %v63_v44 = vsel %vm26_vm0, %v22_v37, 0.0 }
   0x9   :  { %v216_v33 = vadd.f32 %v215_v24, %v214_v16  ;;  %v210_v38 = vrot.slane %v209_v25, 2  ;;  %v223_v42 = vadd.f32 %v222_v32, %v221_v23  ;;  %v242_v48 = vadd.f32 %v66_v43, %v63_v44 }
   0xa   :  { %v203_v39 = vrot.slane %v202_v26, 2  ;;  %v236_v51 = vrot.slane %v235_v40, 4  ;;  %v230_v52 = vadd.f32 %v229_v41, %v228_v31  ;;  %v72_v53 = vsel %vm26_vm0, %v25_v45, 0.0 }
   0xb   :  { %43 = vadd.xlane.f32.xlu1 %v42_v11  ;;  %40 = vadd.xlane.f32.xlu0 %v39_v12  ;;  %v217_v47 = vrot.slane %v216_v33, 2  ;;  %v211_v49 = vadd.f32 %v210_v38, %v209_v25  ;;  %v69_v54 = vsel %vm26_vm0, %v24_v46, 0.0  ;;  %v224_v55 = vrot.slane %v223_v42, 2 }
   0xc   :  { %v204_v50 = vadd.f32 %v203_v39, %v202_v26  ;;  %v249_v56 = vadd.f32 %v72_v53, %v69_v54  ;;  %v243_v58 = vrot.slane %v242_v48, 4  ;;  %v237_v61 = vadd.f32 %v236_v51, %v235_v40 }
   0xd   :  { %v218_v57 = vadd.f32 %v217_v47, %v216_v33  ;;  %v212_v59 = vrot.slane %v211_v49, 1  ;;  %v231_v62 = vrot.slane %v230_v52, 2  ;;  %v225_v63 = vadd.f32 %v224_v55, %v223_v42 }
   0xe   :  { %v205_v60 = vrot.slane %v204_v50, 1  ;;  %v250_v0 = vrot.slane %v249_v56, 4  ;;  %v244_v2 = vadd.f32 %v243_v58, %v242_v48  ;;  %v238_v5 = vrot.slane %v237_v61, 2 }
   0xf   :  { %49 = vadd.xlane.f32.xlu1 %v48_v18  ;;  %46 = vadd.xlane.f32.xlu0 %v45_v19  ;;  %v219_v1 = vrot.slane %v218_v57, 1  ;;  %v213_v3 = vadd.f32 %v212_v59, %v211_v49  ;;  %v232_v6 = vadd.f32 %v231_v62, %v230_v52  ;;  %v226_v7 = vrot.slane %v225_v63, 1 }
  0x10   :  { %v206_v4 = vadd.f32 %v205_v60, %v204_v50  ;;  %v251_v8 = vadd.f32 %v250_v0, %v249_v56  ;;  %v245_v10 = vrot.slane %v244_v2, 2  ;;  %v239_v13 = vadd.f32 %v238_v5, %v237_v61 }
  0x11   :  { %v220_v9 = vadd.f32 %v219_v1, %v218_v57  ;;  %v257_v11 = vmul.f32 0.0625, %v213_v3  ;;  %v233_v14 = vrot.slane %v232_v6, 1  ;;  %v227_v15 = vadd.f32 %v226_v7, %v225_v63 }
  0x12   :  { %v256_v12 = vmul.f32 0.0625, %v206_v4  ;;  %v252_v16 = vrot.slane %v251_v8, 2  ;;  %v246_v18 = vadd.f32 %v245_v10, %v244_v2  ;;  %v240_v19 = vrot.slane %v239_v13, 1 }
  0x13   :  { %55 = vadd.xlane.f32.xlu1 %v54_v27  ;;  %52 = vadd.xlane.f32.xlu0 %v51_v28  ;;  %v258_v17 = vmul.f32 0.0625, %v220_v9  ;;  %v234_v21 = vadd.f32 %v233_v14, %v232_v6  ;;  %v259_v22 = vmul.f32 0.0625, %v227_v15  ;;  %vm196_vm7 = vcmask 1047559  }
  0x14   :  { %v272_v20 = vsel %vm184_vm1, %v257_v11, %v256_v12  ;;  %v253_v23 = vadd.f32 %v252_v16, %v251_v8  ;;  %v247_v24 = vrot.slane %v246_v18, 1  ;;  %v241_v26 = vadd.f32 %v240_v19, %v239_v13 }
  0x15   :  { %v273_v25 = vsel %vm186_vm2, %v258_v17, %v272_v20  ;;  %v260_v27 = vmul.f32 0.0625, %v234_v21  ;;  %vm119_vm8 = vcmask 130112  }
  0x16   :  { %v254_v28 = vrot.slane %v253_v23, 1  ;;  %v274_v29 = vsel %vm188_vm3, %v259_v22, %v273_v25  ;;  %v248_v30 = vadd.f32 %v247_v24, %v246_v18  ;;  %v261_v31 = vmul.f32 0.0625, %v241_v26 }
  0x17   :  { %61 = vadd.xlane.f32.xlu1 %v60_v34  ;;  %58 = vadd.xlane.f32.xlu0 %v57_v35  ;;  %v275_v32 = vsel %vm190_vm4, %v260_v27, %v274_v29 }
  0x18   :  { %v255_v33 = vadd.f32 %v254_v28, %v253_v23  ;;  %v262_v34 = vmul.f32 0.0625, %v248_v30  ;;  %v276_v35 = vsel %vm192_vm5, %v261_v31, %v275_v32 }
  0x1a   :  { %v263_v36 = vmul.f32 0.0625, %v255_v33  ;;  %v277_v37 = vsel %vm194_vm6, %v262_v34, %v276_v35 }
  0x1b   :  { %67 = vadd.xlane.f32.xlu1 %v66_v43  ;;  %64 = vadd.xlane.f32.xlu0 %v63_v44  ;;  %v108_v43 = vlaneseq }
  0x1c   :  { %v278_v38 = vsel %vm196_vm7, %v263_v36, %v277_v37 }
  0x1d   :  { %280 = vst.msk [vmem:[%s399_s2] sm:$0xff] %vm26_vm0, %v278_v38  ;;  %v109_v46 = vand.u32 127, %v108_v43  ;;  %v111_v50 = vshrl.u32 %v108_v43, 7 }
  0x1f   :  { %73 = vadd.xlane.f32.xlu1 %v72_v53  ;;  %70 = vadd.xlane.f32.xlu0 %v69_v54  ;;  %v114_v47 = vadd.s32 4294967288, %v109_v46  ;;  %v112_v56 = vsub.s32 %v109_v46, %v111_v50 }
  0x21   :  { %v117_v51 = vsub.s32 %v114_v47, %v111_v50 }
  0x90   :  { %v35_v39 = vpop.xlane.xlu1 %34  ;;  %v29_v40 = vpop.xlane.xlu0 %28 }
  0x91   :  { %v78_v57 = vmul.f32 0.0625, %v35_v39  ;;  %v76_v58 = vmul.f32 0.0625, %v29_v40 }
  0x93   :  { %v124_v7 = vrot.slane %v78_v57, %v112_v56  ;;  %v113_v8 = vrot.slane %v76_v58, %v112_v56 }
  0x94   :  { %v38_v41 = vpop.xlane.xlu1 %37  ;;  %v32_v42 = vpop.xlane.xlu0 %31 }
  0x95   :  { %v79_v52 = vmul.f32 0.0625, %v38_v41  ;;  %v77_v53 = vmul.f32 0.0625, %v32_v42 }
  0x97   :  { %v128_v63 = vrot.slane %v79_v52, %v117_v51  ;;  %v118_v0 = vrot.slane %v77_v53, %v117_v51 }
  0x98   :  { %v44_v44 = vpop.xlane.xlu1 %43  ;;  %v41_v45 = vpop.xlane.xlu0 %40 }
  0x99   :  { %v81_v59 = vmul.f32 0.0625, %v44_v44  ;;  %v80_v60 = vmul.f32 0.0625, %v41_v45  ;;  %v129_v13 = vsel %vm119_vm8, %v128_v63, %v124_v7  ;;  %v120_v14 = vsel %vm119_vm8, %v118_v0, %v113_v8 }
  0x9a   :  { %v185_v27 = vsel %vm184_vm1, %v129_v13, %v120_v14 }
  0x9b   :  { %v137_v9 = vrot.slane %v81_v59, %v117_v51  ;;  %v133_v10 = vrot.slane %v80_v60, %v112_v56 }
  0x9c   :  { %v50_v48 = vpop.xlane.xlu1 %49  ;;  %v47_v49 = vpop.xlane.xlu0 %46 }
  0x9d   :  { %v83_v61 = vmul.f32 0.0625, %v50_v48  ;;  %v82_v62 = vmul.f32 0.0625, %v47_v49  ;;  %v138_v23 = vsel %vm119_vm8, %v137_v9, %v133_v10 }
  0x9e   :  { %v187_v31 = vsel %vm186_vm2, %v138_v23, %v185_v27 }
  0x9f   :  { %v146_v11 = vrot.slane %v83_v61, %v117_v51  ;;  %v142_v12 = vrot.slane %v82_v62, %v112_v56 }
  0xa0   :  { %v56_v54 = vpop.xlane.xlu1 %55  ;;  %v53_v55 = vpop.xlane.xlu0 %52 }
  0xa1   :  { %v85_v1 = vmul.f32 0.0625, %v56_v54  ;;  %v84_v2 = vmul.f32 0.0625, %v53_v55  ;;  %v147_v24 = vsel %vm119_vm8, %v146_v11, %v142_v12 }
  0xa2   :  { %v189_v35 = vsel %vm188_vm3, %v147_v24, %v187_v31 }
  0xa3   :  { %v155_v15 = vrot.slane %v85_v1, %v117_v51  ;;  %v151_v16 = vrot.slane %v84_v2, %v112_v56 }
  0xa4   :  { %v62_v3 = vpop.xlane.xlu1 %61  ;;  %v59_v4 = vpop.xlane.xlu0 %58 }
  0xa5   :  { %v87_v5 = vmul.f32 0.0625, %v62_v3  ;;  %v86_v6 = vmul.f32 0.0625, %v59_v4  ;;  %v156_v28 = vsel %vm119_vm8, %v155_v15, %v151_v16 }
  0xa6   :  { %v191_v37 = vsel %vm190_vm4, %v156_v28, %v189_v35 }
  0xa7   :  { %v164_v19 = vrot.slane %v87_v5, %v117_v51  ;;  %v160_v20 = vrot.slane %v86_v6, %v112_v56 }
  0xa8   :  { %v68_v17 = vpop.xlane.xlu1 %67  ;;  %v65_v18 = vpop.xlane.xlu0 %64 }
  0xa9   :  { %v89_v21 = vmul.f32 0.0625, %v68_v17  ;;  %v88_v22 = vmul.f32 0.0625, %v65_v18  ;;  %v165_v32 = vsel %vm119_vm8, %v164_v19, %v160_v20 }
  0xaa   :  { %v193_v40 = vsel %vm192_vm5, %v165_v32, %v191_v37 }
  0xab   :  { %v173_v25 = vrot.slane %v89_v21, %v117_v51  ;;  %v169_v26 = vrot.slane %v88_v22, %v112_v56 }
  0xac   :  { %v74_v29 = vpop.xlane.xlu1 %73  ;;  %v71_v30 = vpop.xlane.xlu0 %70 }
  0xad   :  { %v91_v33 = vmul.f32 0.0625, %v74_v29  ;;  %v90_v34 = vmul.f32 0.0625, %v71_v30  ;;  %v174_v36 = vsel %vm119_vm8, %v173_v25, %v169_v26 }
  0xae   :  { %v195_v41 = vsel %vm194_vm6, %v174_v36, %v193_v40 }
  0xaf   :  { %v182_v38 = vrot.slane %v91_v33, %v117_v51  ;;  %v178_v39 = vrot.slane %v90_v34, %v112_v56 }
  0xb1   :  { %v183_v42 = vsel %vm119_vm8, %v182_v38, %v178_v39 }
  0xb2   :  { %v197_v43 = vsel %vm196_vm7, %v183_v42, %v195_v41 }
  0xb3   :  { %199 = vst.msk [vmem:[%s400_s1] sm:$0xff] %vm26_vm0, %v197_v43 }

// kernel: coord_att_forward.5
= control target key start
LH: loop header
LB: loop body
LE: loop exit
PB: predicated region body
PF: predicated region fallthrough
CT: control target
= control target key end

     0   :  { %v422_v3 = vmov 0   ;;  %s604_s0 = inlined_call_operand.vmem [shape: f32[8,16,16], index: 0, kind: input, shape index: {}]   ;;  %s605_s1 = inlined_call_operand.vmem [shape: f32[8,16,1], index: 1, kind: input, shape index: {}]   ;;  %s606_s2 = inlined_call_operand.vmem [shape: f32[8,1,16], index: 2, kind: input, shape index: {}]   ;;  %s607_s3 = inlined_call_operand.hbm [shape: f32[8,16,16], index: 3, kind: output, shape index: {}]  }
   0x1   :  { %v17_v0 = vld [vmem:[%s605_s1 + $0x10] sm:$0xff]  ;;  %v15_v1 = vld [vmem:[%s605_s1] sm:$0xff]  ;;  %v18_v2 = vld [vmem:[%s605_s1 + $0x18] sm:$0xff]  ;;  %349 = vset.pattern.permute.xlu1 %v422_v3  ;;  %348 = vset.pattern.permute.xlu0 %v422_v3 }
   0x2   :  { %v33_v4 = vmul.f32 0.5, %v17_v0  ;;  %v31_v5 = vmul.f32 0.5, %v15_v1  ;;  %v34_v6 = vmul.f32 0.5, %v18_v2  ;;  %v16_v7 = vld [vmem:[%s605_s1 + $0x8] sm:$0xff]  ;;  %v19_v9 = vld [vmem:[%s605_s1 + $0x20] sm:$0xff]  ;;  %v22_v11 = vld [vmem:[%s605_s1 + $0x38] sm:$0xff] }
   0x3   :  { %v20_v8 = vld [vmem:[%s605_s1 + $0x28] sm:$0xff]  ;;  %v32_v10 = vmul.f32 0.5, %v16_v7  ;;  %v21_v13 = vld [vmem:[%s605_s1 + $0x30] sm:$0xff]  ;;  %v35_v14 = vmul.f32 0.5, %v19_v9  ;;  %v38_v15 = vmul.f32 0.5, %v22_v11  ;;  %v23_v18 = vld [vmem:[%s605_s1 + $0x40] sm:$0xff] }
   0x4   :  { %350 = vtanh.f32 %v33_v4  ;;  %v36_v12 = vmul.f32 0.5, %v20_v8  ;;  %v37_v16 = vmul.f32 0.5, %v21_v13  ;;  %v24_v17 = vld [vmem:[%s605_s1 + $0x48] sm:$0xff] }
   0x5   :  { %352 = vtanh.f32 %v31_v5 }
   0x6   :  { %354 = vtanh.f32 %v34_v6 }
   0x7   :  { %356 = vtanh.f32 %v32_v10 }
   0x8   :  { %358 = vtanh.f32 %v36_v12 }
   0x9   :  { %8 = vsyncpa [#allocation3], 0  ;;  %360 = vtanh.f32 %v35_v14  ;;  %v40_v19 = vmul.f32 0.5, %v24_v17  ;;  %v39_v20 = vmul.f32 0.5, %v23_v18  ;;  %v26_v21 = vld [vmem:[%s605_s1 + $0x58] sm:$0xff]  ;;  %v25_v22 = vld [vmem:[%s605_s1 + $0x50] sm:$0xff] }
   0xa   :  { %362 = vtanh.f32 %v38_v15  ;;  %v42_v24 = vmul.f32 0.5, %v26_v21  ;;  %v41_v27 = vmul.f32 0.5, %v25_v22  ;;  %v28_v28 = vld [vmem:[%s605_s1 + $0x68] sm:$0xff]  ;;  %v27_v31 = vld [vmem:[%s605_s1 + $0x60] sm:$0xff]  ;;  %v30_v43 = vld [vmem:[%s605_s1 + $0x78] sm:$0xff]  ;;  %vm311_vm0 = vcmask 130048  }
   0xb   :  { %364 = vtanh.f32 %v37_v16  ;;  %v44_v38 = vmul.f32 0.5, %v28_v28  ;;  %v43_v42 = vmul.f32 0.5, %v27_v31  ;;  %v29_v47 = vld [vmem:[%s605_s1 + $0x70] sm:$0xff]  ;;  %v46_v49 = vmul.f32 0.5, %v30_v43  ;;  %v96_v17 = vld [vmem:[%s606_s2 + $0x1] sm:$0x1] }
   0xc   :  { %366 = vtanh.f32 %v40_v19  ;;  %v45_v52 = vmul.f32 0.5, %v29_v47  ;;  %v95_v18 = vld [vmem:[%s606_s2] sm:$0x1]  ;;  %v104_v19 = vmul.f32 0.5, %v96_v17  ;;  %v97_v21 = vld [vmem:[%s606_s2 + $0x2] sm:$0x1] }
   0xd   :  { %368 = vtanh.f32 %v39_v20  ;;  %v103_v20 = vmul.f32 0.5, %v95_v18  ;;  %v105_v22 = vmul.f32 0.5, %v97_v21  ;;  %v135_v43 = vld [vmem:[%s604_s0] sm:$0xff]  ;;  %s423_s8 = smov [#allocation2]  }
   0xe   :  { %v351_v23 = vpop.eup %350  ;;  %370 = vtanh.f32 %v42_v24  ;;  %s333_s9 = sshll.u32 %s423_s8, 4  ;;  %s334_s9 = int_to_ptr.vmem [resolvable:$true] %s333_s9 }
   0xf   :  { %v353_v25 = vpop.eup %352  ;;  %v65_v26 = vadd.f32 1.0, %v351_v23  ;;  %372 = vtanh.f32 %v41_v27  ;;  %v98_v23 = vld [vmem:[%s606_s2 + $0x3] sm:$0x1]  ;;  %s398_s10 = scalar_lea.vmem %s334_s9, 2048  ;;  %p403_p1 = scmp.lt.s32.totalorder %s334_s9, %s334_s9 }
  0x10   :  { %v355_v29 = vpop.eup %354  ;;  %v63_v30 = vadd.f32 1.0, %v353_v25  ;;  %374 = vtanh.f32 %v44_v38  ;;  %v106_v24 = vmul.f32 0.5, %v98_v23  ;;  %v255_v25 = vlaneseq  ;;  %p399_p0 = scmp.ne.s32.totalorder %s334_s9, %s398_s10  ;;  %p404_p2 = scmp.lt.s32.totalorder %s398_s10, %s398_s10 }
  0x11   :  { %v357_v32 = vpop.eup %356  ;;  %v81_v33 = vmul.f32 0.5, %v65_v26  ;;  %v66_v34 = vadd.f32 1.0, %v355_v29  ;;  %376 = vtanh.f32 %v43_v42  ;;  %v99_v26 = vld [vmem:[%s606_s2 + $0x4] sm:$0x1] }
  0x12   :  { %v359_v35 = vpop.eup %358  ;;  %v79_v36 = vmul.f32 0.5, %v63_v30  ;;  %v64_v37 = vadd.f32 1.0, %v357_v32  ;;  %378 = vtanh.f32 %v46_v49  ;;  %v107_v29 = vmul.f32 0.5, %v99_v26  ;;  %v100_v32 = vld [vmem:[%s606_s2 + $0x5] sm:$0x1]  ;;  %p405_p3 = por %p404_p2, %p403_p1 }
  0x13   :  { %v361_v39 = vpop.eup %360  ;;  %163 = vperm.xlu1 %349, %v81_v33   ;;  %v82_v40 = vmul.f32 0.5, %v66_v34  ;;  %v68_v41 = vadd.f32 1.0, %v359_v35  ;;  %380 = vtanh.f32 %v45_v52  ;;  %v256_v31 = vshrl.u32 %v255_v25, 7  ;;  %v138_v52 = vld [vmem:[%s604_s0 + $0x18] sm:$0xff] }
  0x14   :  { %v363_v44 = vpop.eup %362  ;;  %153 = vperm.xlu0 %348, %v79_v36   ;;  %v80_v45 = vmul.f32 0.5, %v64_v37  ;;  %v67_v46 = vadd.f32 1.0, %v361_v39  ;;  %382 = vtanh.f32 %v104_v19  ;;  %v108_v34 = vmul.f32 0.5, %v100_v32  ;;  %v101_v37 = vld [vmem:[%s606_s2 + $0x6] sm:$0x1]  ;;  %p406_p4 = pnand %p405_p3, %p399_p0 }
  0x15   :  { %v365_v48 = vpop.eup %364  ;;  %v84_v50 = vmul.f32 0.5, %v68_v41  ;;  %v70_v51 = vadd.f32 1.0, %v363_v44  ;;  %384 = vtanh.f32 %v103_v20  ;;  %v512_v36 = vsub.s32 0, %v256_v31 }
  0x16   :  { %v367_v53 = vpop.eup %366  ;;  %v83_v54 = vmul.f32 0.5, %v67_v46  ;;  %v69_v55 = vadd.f32 1.0, %v365_v48  ;;  %386 = vtanh.f32 %v105_v22  ;;  %v109_v41 = vmul.f32 0.5, %v101_v37  ;;  %v146_v37 = vld [vmem:[%s604_s0 + $0x58] sm:$0xff] }
  0x17   :  { %168 = vperm.xlu1 %349, %v82_v40   ;;  %v369_v56 = vpop.eup %368  ;;  %v86_v57 = vmul.f32 0.5, %v70_v51  ;;  %v72_v58 = vadd.f32 1.0, %v367_v53  ;;  %388 = vtanh.f32 %v106_v24  ;;  %v137_v40 = vld [vmem:[%s604_s0 + $0x10] sm:$0xff]  ;;  %v144_v24 = vld [vmem:[%s604_s0 + $0x48] sm:$0xff] }
  0x18   :  { %158 = vperm.xlu0 %348, %v80_v45   ;;  %v371_v59 = vpop.eup %370  ;;  %v85_v60 = vmul.f32 0.5, %v69_v55  ;;  %v71_v61 = vadd.f32 1.0, %v369_v56  ;;  %390 = vtanh.f32 %v107_v29  ;;  %v102_v45 = vld [vmem:[%s606_s2 + $0x7] sm:$0x1]  ;;  %v136_v55 = vld [vmem:[%s604_s0 + $0x8] sm:$0xff] }
  0x19   :  { %v373_v62 = vpop.eup %372  ;;  %v88_v63 = vmul.f32 0.5, %v72_v58  ;;  %v74_v0 = vadd.f32 1.0, %v371_v59  ;;  %392 = vtanh.f32 %v108_v34  ;;  %v110_v53 = vmul.f32 0.5, %v102_v45 }
  0x1a   :  { %v375_v1 = vpop.eup %374  ;;  %v87_v2 = vmul.f32 0.5, %v71_v61  ;;  %v73_v3 = vadd.f32 1.0, %v373_v62  ;;  %394 = vtanh.f32 %v109_v41 }
  0x1b   :  { %178 = vperm.xlu1 %349, %v84_v50   ;;  %v377_v4 = vpop.eup %376  ;;  %v90_v5 = vmul.f32 0.5, %v74_v0  ;;  %v76_v6 = vadd.f32 1.0, %v375_v1  ;;  %v140_v0 = vld [vmem:[%s604_s0 + $0x28] sm:$0xff]  ;;  %396 = vtanh.f32 %v110_v53 }
  0x1c   :  { %173 = vperm.xlu0 %348, %v83_v54   ;;  %v379_v7 = vpop.eup %378  ;;  %v89_v8 = vmul.f32 0.5, %v73_v3  ;;  %v75_v9 = vadd.f32 1.0, %v377_v4  ;;  %v139_v3 = vld [vmem:[%s604_s0 + $0x20] sm:$0xff] }
  0x1d   :  { %v381_v10 = vpop.eup %380  ;;  %v92_v11 = vmul.f32 0.5, %v76_v6  ;;  %v78_v12 = vadd.f32 1.0, %v379_v7 }
  0x1e   :  { %v91_v13 = vmul.f32 0.5, %v75_v9  ;;  %v77_v14 = vadd.f32 1.0, %v381_v10  ;;  %v383_v27 = vpop.eup %382 }
  0x1f   :  { %188 = vperm.xlu1 %349, %v86_v57   ;;  %v94_v15 = vmul.f32 0.5, %v78_v12  ;;  %v385_v28 = vpop.eup %384  ;;  %v120_v30 = vadd.f32 1.0, %v383_v27  ;;  %v142_v12 = vld [vmem:[%s604_s0 + $0x38] sm:$0xff]  ;;  %v143_v27 = vld [vmem:[%s604_s0 + $0x40] sm:$0xff] }
  0x20   :  { %183 = vperm.xlu0 %348, %v85_v60   ;;  %v93_v16 = vmul.f32 0.5, %v77_v14  ;;  %v119_v33 = vadd.f32 1.0, %v385_v28  ;;  %v387_v38 = vpop.eup %386 }
  0x21   :  { %v128_v35 = vmul.f32 0.5, %v120_v30  ;;  %v121_v44 = vadd.f32 1.0, %v387_v38  ;;  %v389_v46 = vpop.eup %388 }
  0x22   :  { %v127_v39 = vmul.f32 0.5, %v119_v33  ;;  %v122_v57 = vadd.f32 1.0, %v389_v46  ;;  %v391_v58 = vpop.eup %390 }
  0x23   :  { %198 = vperm.xlu1 %349, %v88_v63   ;;  %v262_v42 = vrot.slane %v128_v35, %v512_v36  ;;  %v129_v56 = vmul.f32 0.5, %v121_v44  ;;  %v393_v6 = vpop.eup %392 }
  0x24   :  { %193 = vperm.xlu0 %348, %v87_v2   ;;  %v258_v48 = vrot.slane %v127_v39, %v512_v36  ;;  %v130_v4 = vmul.f32 0.5, %v122_v57  ;;  %v124_v17 = vadd.f32 1.0, %v393_v6  ;;  %v395_v18 = vpop.eup %394 }
  0x25   :  { %v266_v2 = vrot.slane %v129_v56, %v512_v36  ;;  %v125_v29 = vadd.f32 1.0, %v395_v18  ;;  %v397_v30 = vpop.eup %396 }
  0x26   :  { %v270_v14 = vrot.slane %v130_v4, %v512_v36  ;;  %v132_v28 = vmul.f32 0.5, %v124_v17 }
  0x27   :  { %208 = vperm.xlu1 %349, %v90_v5   ;;  %v123_v5 = vadd.f32 1.0, %v391_v58  ;;  %v133_v41 = vmul.f32 0.5, %v125_v29  ;;  %v150_v58 = vld [vmem:[%s604_s0 + $0x78] sm:$0xff] }
  0x28   :  { %203 = vperm.xlu0 %348, %v89_v8   ;;  %v278_v39 = vrot.slane %v132_v28, %v512_v36 }
  0x2b   :  { %218 = vperm.xlu1 %349, %v92_v11  }
  0x2c   :  { %213 = vperm.xlu0 %348, %v91_v13  }
  0x2f   :  { %228 = vperm.xlu1 %349, %v94_v15   ;;  %v141_v15 = vld [vmem:[%s604_s0 + $0x30] sm:$0xff] }
  0x30   :  { %223 = vperm.xlu0 %348, %v93_v16   ;;  %v131_v16 = vmul.f32 0.5, %v123_v5 }
  0x32   :  { %v274_v26 = vrot.slane %v131_v16, %v512_v36 }
  0x92   :  { %v164_v47 = vpop.permute.xlu1 %163 }
  0x93   :  { %v233_v49 = vmul.f32 %v164_v47, %v137_v40  ;;  %v154_v50 = vpop.permute.xlu0 %153  ;;  %v145_v40 = vld [vmem:[%s604_s0 + $0x50] sm:$0xff] }
  0x94   :  { %v231_v51 = vmul.f32 %v154_v50, %v135_v43  ;;  %v282_v50 = vrot.slane %v133_v41, %v512_v36 }
  0x95   :  { %v297_v54 = vmul.f32 %v262_v42, %v233_v49 }
  0x96   :  { %v295_v59 = vmul.f32 %v258_v48, %v231_v51  ;;  %v169_v60 = vpop.permute.xlu1 %168  ;;  %v147_v51 = vld [vmem:[%s604_s0 + $0x60] sm:$0xff] }
  0x97   :  { %314 = vst.msk [vmem:[#allocation2 + $0x10] sm:$0xff] %vm311_vm0, %v297_v54  ;;  %v234_v61 = vmul.f32 %v169_v60, %v138_v52  ;;  %v159_v62 = vpop.permute.xlu0 %158 }
  0x98   :  { %312 = vst.msk [vmem:[#allocation2] sm:$0xff] %vm311_vm0, %v295_v59  ;;  %v232_v63 = vmul.f32 %v159_v62, %v136_v55 }
  0x99   :  { %v298_v1 = vmul.f32 %v262_v42, %v234_v61  ;;  %v126_v42 = vadd.f32 1.0, %v397_v30  ;;  %v149_v61 = vld [vmem:[%s604_s0 + $0x70] sm:$0xff] }
  0x9a   :  { %v296_v7 = vmul.f32 %v258_v48, %v232_v63  ;;  %v179_v8 = vpop.permute.xlu1 %178  ;;  %v148_v48 = vld [vmem:[%s604_s0 + $0x68] sm:$0xff] }
  0x9b   :  { %315 = vst.msk [vmem:[#allocation2 + $0x18] sm:$0xff] %vm311_vm0, %v298_v1  ;;  %v236_v9 = vmul.f32 %v179_v8, %v140_v0  ;;  %v174_v10 = vpop.permute.xlu0 %173  ;;  %v134_v52 = vmul.f32 0.5, %v126_v42 }
  0x9c   :  { %313 = vst.msk [vmem:[#allocation2 + $0x8] sm:$0xff] %vm311_vm0, %v296_v7  ;;  %v235_v11 = vmul.f32 %v174_v10, %v139_v3 }
  0x9d   :  { %v300_v13 = vmul.f32 %v266_v2, %v236_v9  ;;  %v286_v60 = vrot.slane %v134_v52, %v512_v36 }
  0x9e   :  { %v299_v19 = vmul.f32 %v266_v2, %v235_v11  ;;  %v189_v20 = vpop.permute.xlu1 %188 }
  0x9f   :  { %317 = vst.msk [vmem:[#allocation2 + $0x28] sm:$0xff] %vm311_vm0, %v300_v13  ;;  %v238_v21 = vmul.f32 %v189_v20, %v142_v12  ;;  %v184_v22 = vpop.permute.xlu0 %183 }
  0xa0   :  { %316 = vst.msk [vmem:[#allocation2 + $0x20] sm:$0xff] %vm311_vm0, %v299_v19  ;;  %v237_v23 = vmul.f32 %v184_v22, %v141_v15 }
  0xa1   :  { %v302_v25 = vmul.f32 %v270_v14, %v238_v21 }
  0xa2   :  { %v301_v31 = vmul.f32 %v270_v14, %v237_v23  ;;  %v199_v32 = vpop.permute.xlu1 %198 }
  0xa3   :  { %319 = vst.msk [vmem:[#allocation2 + $0x38] sm:$0xff] %vm311_vm0, %v302_v25  ;;  %v240_v33 = vmul.f32 %v199_v32, %v144_v24  ;;  %v194_v34 = vpop.permute.xlu0 %193 }
  0xa4   :  { %318 = vst.msk [vmem:[#allocation2 + $0x30] sm:$0xff] %vm311_vm0, %v301_v31  ;;  %v239_v35 = vmul.f32 %v194_v34, %v143_v27 }
  0xa5   :  { %v304_v38 = vmul.f32 %v274_v26, %v240_v33 }
  0xa6   :  { %v303_v43 = vmul.f32 %v274_v26, %v239_v35  ;;  %v209_v44 = vpop.permute.xlu1 %208 }
  0xa7   :  { %321 = vst.msk [vmem:[#allocation2 + $0x48] sm:$0xff] %vm311_vm0, %v304_v38  ;;  %v242_v45 = vmul.f32 %v209_v44, %v146_v37  ;;  %v204_v46 = vpop.permute.xlu0 %203 }
  0xa8   :  { %320 = vst.msk [vmem:[#allocation2 + $0x40] sm:$0xff] %vm311_vm0, %v303_v43  ;;  %v241_v47 = vmul.f32 %v204_v46, %v145_v40 }
  0xa9   :  { %v306_v49 = vmul.f32 %v278_v39, %v242_v45 }
  0xaa   :  { %v305_v53 = vmul.f32 %v278_v39, %v241_v47  ;;  %v219_v54 = vpop.permute.xlu1 %218 }
  0xab   :  { %323 = vst.msk [vmem:[#allocation2 + $0x58] sm:$0xff] %vm311_vm0, %v306_v49  ;;  %v244_v55 = vmul.f32 %v219_v54, %v148_v48  ;;  %v214_v56 = vpop.permute.xlu0 %213 }
  0xac   :  { %322 = vst.msk [vmem:[#allocation2 + $0x50] sm:$0xff] %vm311_vm0, %v305_v53  ;;  %v243_v57 = vmul.f32 %v214_v56, %v147_v51 }
  0xad   :  { %v308_v59 = vmul.f32 %v282_v50, %v244_v55 }
  0xae   :  { %v307_v62 = vmul.f32 %v282_v50, %v243_v57  ;;  %v229_v63 = vpop.permute.xlu1 %228 }
  0xaf   :  { %325 = vst.msk [vmem:[#allocation2 + $0x68] sm:$0xff] %vm311_vm0, %v308_v59  ;;  %v246_v0 = vmul.f32 %v229_v63, %v150_v58  ;;  %v224_v1 = vpop.permute.xlu0 %223 }
  0xb0   :  { %324 = vst.msk [vmem:[#allocation2 + $0x60] sm:$0xff] %vm311_vm0, %v307_v62  ;;  %v245_v2 = vmul.f32 %v224_v1, %v149_v61 }
  0xb1   :  { %v310_v3 = vmul.f32 %v286_v60, %v246_v0 }
  0xb2   :  { %v309_v4 = vmul.f32 %v286_v60, %v245_v2 }
  0xb3   :  { %327 = vst.msk [vmem:[#allocation2 + $0x78] sm:$0xff] %vm311_vm0, %v310_v3 }
  0xb4   :  { %326 = vst.msk [vmem:[#allocation2 + $0x70] sm:$0xff] %vm311_vm0, %v309_v4 }
  0xb5   :  { %409 = shalt.err (!%p406_p4)
}
  0xb6   :  { %s410_s12 = scalar_lea.hbm %s607_s3, 2048 }
  0xb7   :  { %p411_p5 = scmp.ne.s32.totalorder %s607_s3, %s410_s12  ;;  %p414_p6 = scmp.lt.u32.totalorder %s410_s12, %s607_s3 }
  0xb9   :  { %p416_p7 = pnand %p414_p6, %p411_p5 }
  0xbb   :  { %419 = shalt.err (!%p416_p7)
}
  0xbc   :  { %s424_s16 = smov 128   ;;  %s425_s1 = smov 8  }
  0xbd   :  { %339 = dma.vmem_to_hbm [thread:$0]  %s334_s9, 2048, %s607_s3, [#allocation3], %s424_s16, %s424_s16, %s425_s1  }
  0xbe   :  { %420 = dma.done.wait [#allocation3], 2048  }
  0xbf   :  { %421 = vsyncadd [#allocation3], 4294965248 }
  0xc0   :  { %343 = vsyncpa [#allocation3], 1 }

// kernel: coord_att_forward.4
= control target key start
LH: loop header
LB: loop body
LE: loop exit
PB: predicated region body
PF: predicated region fallthrough
CT: control target
= control target key end

     0   :  { %s1755_s27 = smov 0   ;;  %s2190_s0 = inlined_call_operand.vmem [shape: f32[2,4,32], index: 0, kind: input, shape index: {}]   ;;  %s2191_s1 = inlined_call_operand.vmem [shape: f32[8,4,1], index: 1, kind: input, shape index: {}]   ;;  %s2192_s2 = inlined_call_operand.vmem [shape: f32[8,8,1], index: 2, kind: input, shape index: {}]   ;;  %s2193_s3 = inlined_call_operand.vmem [shape: f32[4,8,1], index: 3, kind: input, shape index: {}]   ;;  %s2194_s4 = inlined_call_operand.vmem [shape: f32[4,8,1], index: 4, kind: input, shape index: {}]   ;;  %s2195_s5 = inlined_call_operand.vmem [shape: f32[14,8,1], index: 5, kind: input, shape index: {}]   ;;  %s2196_s6 = inlined_call_operand.vmem [shape: f32[2,4,1], index: 6, kind: input, shape index: {}]   ;;  %s2197_s7 = inlined_call_operand.vmem [shape: f32[2,4,32], index: 7, kind: output, shape index: {0}]   ;;  %s2198_s8 = inlined_call_operand.vmem [shape: f32[2,4,32], index: 8, kind: output, shape index: {1}]  }
   0x1 LB: > { %s1509_s28 = sadd.s32 4294967295, %s1703_s27   ;;  %p1513_p0 = scmp.ge.s32.totalorder %s1703_s27, 1  ;;  %s1703_s27 = sphi %s1755_s27, %s19_s27  }
   0x2   : > { %p264_p1 = scmp.lt.s32.totalorder %s1703_s27, 3 }
   0x4   : > { %p265_p2 = pnand %p1513_p0, %p264_p1 }
   0x5   : > { %v347_v0 = vld [vmem:[%s2191_s1 + $0x4] sm:$0xf] (!%p265_p2)  ;;  %v346_v1 = vld [vmem:[%s2191_s1] sm:$0xf] (!%p265_p2)  ;;  %v1705_v2 = vmov (!%p265_p2), 0   ;;  %v1526_v10 = vld [vmem:[%s2195_s5 + $0x10] sm:$0xff] (!%p265_p2)  ;;  %v313_v15 = vlaneseq (!%p265_p2) }
   0x6   : > { %268 = sbr.rel (%p265_p2) target bundleno = 736 (0x2e0), region = 48  ;;  %1664 = vset.pattern.permute.xlu1 (!%p265_p2), %v1705_v2  ;;  %1663 = vset.pattern.permute.xlu0 (!%p265_p2), %v1705_v2  ;;  %v348_v3 = vld [vmem:[%s2191_s1 + $0x8] sm:$0xf] (!%p265_p2)  ;;  %v349_v4 = vld [vmem:[%s2191_s1 + $0xc] sm:$0xf] (!%p265_p2)  ;;  %v459_v9 = vld [vmem:[%s2195_s5] sm:$0xff] (!%p265_p2) }
   0x7   : > { %361 = vperm.xlu0 (!%p265_p2), %1663, %v347_v0   ;;  %356 = vperm.xlu1 (!%p265_p2), %1664, %v346_v1   ;;  %v350_v5 = vld [vmem:[%s2191_s1 + $0x10] sm:$0xf] (!%p265_p2)  ;;  %v351_v6 = vld [vmem:[%s2191_s1 + $0x14] sm:$0xf] (!%p265_p2)  ;;  %v352_v7 = vld [vmem:[%s2191_s1 + $0x18] sm:$0xf] (!%p265_p2) }
   0x8   : > { %v353_v8 = vld [vmem:[%s2191_s1 + $0x1c] sm:$0xf] (!%p265_p2)  ;;  %v1528_v12 = vld [vmem:[%s2195_s5 + $0x20] sm:$0xff] (!%p265_p2)  ;;  %v1529_v13 = vld [vmem:[%s2195_s5 + $0x8] sm:$0xff] (!%p265_p2)  ;;  %v314_v18 = vshrl.u32 (!%p265_p2), %v313_v15, 7  ;;  %v319_v19 = vand.u32 (!%p265_p2), 127, %v313_v15 }
   0x9   : > { %v1527_v11 = vld [vmem:[%s2195_s5 + $0x18] sm:$0xff] (!%p265_p2)  ;;  %v1530_v14 = vld [vmem:[%s2195_s5 + $0x28] sm:$0xff] (!%p265_p2)  ;;  %v1531_v16 = vld [vmem:[%s2195_s5 + $0x30] sm:$0xff] (!%p265_p2)  ;;  %v1706_v25 = vmov (!%p265_p2), 0.0|0.0   ;;  %v1707_v31 = vmov (!%p265_p2), 1.0|1.0  }
   0xa   : > { %v806_v17 = vld [vmem:[%s2192_s2 + $0x8] sm:$0xff] (!%p265_p2)  ;;  %v315_v20 = vadd.s32 (!%p265_p2), 8, %v314_v18  ;;  %v807_v21 = vld [vmem:[%s2192_s2 + $0x10] sm:$0xff] (!%p265_p2)  ;;  %v805_v22 = vld [vmem:[%s2192_s2] sm:$0xff] (!%p265_p2)  ;;  %v1517_v23 = vadd.s32 (!%p265_p2), 4294967295, %v319_v19  ;;  %v333_v24 = vadd.s32 (!%p265_p2), 1, %v319_v19  ;;  %1626 = vmatprep.subr.bf16.mxu0 (!%p265_p2), %v1706_v25  ;;  %1632 = vmatprep.subr.bf16.mxu1 (!%p265_p2), %v1706_v25 }
   0xb   : > { %366 = vperm.xlu0 (!%p265_p2), %1663, %v348_v3   ;;  %371 = vperm.xlu1 (!%p265_p2), %1664, %v349_v4   ;;  %v316_v27 = vadd.s32 (!%p265_p2), 16, %v314_v18  ;;  %v317_v28 = vadd.s32 (!%p265_p2), 24, %v314_v18  ;;  %v808_v29 = vld [vmem:[%s2192_s2 + $0x18] sm:$0xff] (!%p265_p2)  ;;  %v809_v30 = vld [vmem:[%s2192_s2 + $0x20] sm:$0xff] (!%p265_p2)  ;;  %vm1708_vm11 = vmmov (!%p265_p2), 0   ;;  %v1709_v34 = vmov (!%p265_p2), 0.0  }
   0xc   : > { %vm321_vm0 = vcmp.eq.s32.totalorder (!%p265_p2), %v314_v18, %v1517_v23  ;;  %vm322_vm1 = vcmp.eq.s32.totalorder (!%p265_p2), %v315_v20, %v1517_v23  ;;  %vm334_vm2 = vcmp.eq.s32.totalorder (!%p265_p2), %v314_v18, %v333_v24  ;;  %vm335_vm3 = vcmp.eq.s32.totalorder (!%p265_p2), %v315_v20, %v333_v24  ;;  %1590 = vmatprep.mubr.msk.f32.mxu0 (!%p265_p2), %vm1708_vm11, %v1709_v34  ;;  %v810_v36 = vld [vmem:[%s2192_s2 + $0x28] sm:$0xff] (!%p265_p2)  ;;  %v811_v37 = vld [vmem:[%s2192_s2 + $0x30] sm:$0xff] (!%p265_p2)  ;;  %v812_v38 = vld [vmem:[%s2192_s2 + $0x38] sm:$0xff] (!%p265_p2)  ;;  %p300_p3 = scmp.lt.s32.totalorder (!%p265_p2), %s1509_s28, 1 }
   0xd   : > { %vm1819_vm4 = vmpackc.low %vm322_vm1, %vm321_vm0  ;;  %vm323_vm6 = vcmp.eq.s32.totalorder %v316_v27, %v1517_v23  ;;  %vm324_vm7 = vcmp.eq.s32.totalorder %v317_v28, %v1517_v23  ;;  %vm336_vm8 = vcmp.eq.s32.totalorder %v316_v27, %v333_v24  ;;  %vm337_vm10 = vcmp.eq.s32.totalorder %v317_v28, %v333_v24  ;;  %1601 = vmatprep.mubr.msk.f32.mxu1 %vm1708_vm11, %v1709_v34  ;;  %v1542_v39 = vld [vmem:[%s2195_s5 + $0x38] sm:$0xff]  ;;  %v1543_v40 = vld [vmem:[%s2195_s5 + $0x48] sm:$0xff] }
   0xe   : > { %1628 = vmatpush3.bf16.msk.msra.mxu0 %vm1819_vm4, %v1707_v31  ;;  %vm1832_vm5 = vmpackc.low %vm335_vm3, %vm334_vm2  ;;  %v1544_v41 = vld [vmem:[%s2195_s5 + $0x50] sm:$0xff]  ;;  %v1545_v42 = vld [vmem:[%s2195_s5 + $0x58] sm:$0xff]  ;;  %s2208_s28 = smov (!%p300_p3, %s1509_s28), 1  ;;  %vm402_vm13 = vcmask 257024   ;;  %vm508_vm14 = vcmask 1041409   ;;  %vm511_vm15 = vcmask 1042434  }
   0xf   : > { %376 = vperm.xlu0 %1663, %v350_v5   ;;  %381 = vperm.xlu1 %1664, %v351_v6   ;;  %vm1841_vm9 = vmpackc.low %vm324_vm7, %vm323_vm6  ;;  %v1546_v43 = vld [vmem:[%s2195_s5 + $0x40] sm:$0xff]  ;;  %v1548_v45 = vld [vmem:[%s2195_s5 + $0x68] sm:$0xff]  ;;  %s1925_s29 = sshll.u32 %s2208_s28, 2  ;;  %vm514_vm0 = vcmask 1043459   ;;  %vm517_vm1 = vcmask 1044484   ;;  %vm520_vm2 = vcmask 1045509  }
  0x10   : > { %1634 = vmatpush3.bf16.msk.msra.mxu1 %vm1832_vm5, %v1707_v31  ;;  %1629 = vmatprep.subr.bf16.mxu0 %v1706_v25  ;;  %vm1847_vm12 = vmpackc.low %vm337_vm10, %vm336_vm8  ;;  %v1547_v44 = vld [vmem:[%s2195_s5 + $0x60] sm:$0xff]  ;;  %v1257_v46 = vld [vmem:[%s2193_s3 + $0x8] sm:$0xff]  ;;  %s303_s10 = scalar_lea.vmem %s2190_s0, %s1925_s29  ;;  %vm523_vm3 = vcmask 1046534   ;;  %vm526_vm6 = vcmask 1047559   ;;  %vm528_vm7 = vcmask 261120   ;;  %s307_s12 = scalar_lea.vmem %s2197_s7, %s1925_s29 }
  0x11   : > { %1635 = vmatprep.subr.bf16.mxu1 %v1706_v25  ;;  %v1341_v47 = vld [vmem:[%s2194_s4 + $0x8] sm:$0xff]  ;;  %v1258_v48 = vld [vmem:[%s2193_s3 + $0x10] sm:$0xff]  ;;  %v1256_v50 = vld [vmem:[%s2193_s3] sm:$0xff]  ;;  %s311_s15 = scalar_lea.vmem %s2198_s8, %s1925_s29 }
  0x12   : > { %1631 = vmatpush3.bf16.msk.msra.mxu0 %vm1841_vm9, %v1707_v31  ;;  %v1342_v49 = vld [vmem:[%s2194_s4 + $0x10] sm:$0xff]  ;;  %v1259_v51 = vld [vmem:[%s2193_s3 + $0x18] sm:$0xff]  ;;  %v1340_v52 = vld [vmem:[%s2194_s4] sm:$0xff] }
  0x13   : > { %386 = vperm.xlu0 %1663, %v352_v7   ;;  %391 = vperm.xlu1 %1664, %v353_v8   ;;  %v1343_v53 = vld [vmem:[%s2194_s4 + $0x18] sm:$0xff]  ;;  %v1312_v54 = vld [vmem:[%s2196_s6] sm:$0xf]  ;;  %v1559_v55 = vld [vmem:[%s2196_s6 + $0x4] sm:$0xf] }
  0x14   : > { %1637 = vmatpush3.bf16.msk.msra.mxu1 %vm1847_vm12, %v1707_v31  ;;  %1638 = vmatprep.subr.bf16.mxu0 %v1706_v25  ;;  %v312_v56 = vld [vmem:[%s303_s10] sm:$0xf] }
  0x15   : > { %1644 = vmatprep.subr.bf16.mxu1 %v1706_v25 }
  0x17   : > { %462 = vperm.xlu0 %1663, %v459_v9   ;;  %673 = vperm.xlu1 %1664, %v1526_v10  }
  0x1b   : > { %679 = vperm.xlu0 %1663, %v1527_v11   ;;  %687 = vperm.xlu1 %1664, %v1528_v12  }
  0x1f   : > { %694 = vperm.xlu0 %1663, %v1529_v13   ;;  %772 = vperm.xlu1 %1664, %v1530_v14  }
  0x23   : > { %801 = vperm.xlu0 %1663, %v1531_v16   ;;  %820 = vperm.xlu1 %1664, %v806_v17  }
  0x27   : > { %825 = vperm.xlu0 %1663, %v807_v21   ;;  %815 = vperm.xlu1 %1664, %v805_v22  }
  0x2b   : > { %830 = vperm.xlu0 %1663, %v808_v29   ;;  %835 = vperm.xlu1 %1664, %v809_v30  }
  0x2f   : > { %840 = vperm.xlu0 %1663, %v810_v36   ;;  %845 = vperm.xlu1 %1664, %v811_v37  }
  0x33   : > { %850 = vperm.xlu0 %1663, %v812_v38   ;;  %921 = vperm.xlu1 %1664, %v1542_v39  }
  0x37   : > { %1124 = vperm.xlu0 %1663, %v1543_v40   ;;  %1130 = vperm.xlu1 %1664, %v1544_v41  }
  0x3b   : > { %1138 = vperm.xlu0 %1663, %v1545_v42   ;;  %1145 = vperm.xlu1 %1664, %v1546_v43  }
  0x3f   : > { %1223 = vperm.xlu0 %1663, %v1547_v44   ;;  %1252 = vperm.xlu1 %1664, %v1548_v45  }
  0x43   : > { %1267 = vperm.xlu0 %1663, %v1257_v46   ;;  %1351 = vperm.xlu1 %1664, %v1341_v47  }
  0x47   : > { %1272 = vperm.xlu0 %1663, %v1258_v48   ;;  %1356 = vperm.xlu1 %1664, %v1342_v49  }
  0x4b   : > { %1262 = vperm.xlu0 %1663, %v1256_v50   ;;  %1277 = vperm.xlu1 %1664, %v1259_v51  }
  0x4f   : > { %1346 = vperm.xlu0 %1663, %v1340_v52   ;;  %1361 = vperm.xlu1 %1664, %v1343_v53  }
  0x53   : > { %1315 = vperm.xlu0 %1663, %v1312_v54   ;;  %1400 = vperm.xlu1 %1664, %v1559_v55  }
  0x86   : > { %v362_v57 = vpop.permute.xlu0 %361  ;;  %v357_v58 = vpop.permute.xlu1 %356 }
  0x87   : > { %v395_v59 = vmul.f32 %v362_v57, %v312_v56  ;;  %v394_v60 = vmul.f32 %v357_v58, %v312_v56 }
  0x89   : > { %v410_v61 = vsel %vm402_vm13, %v395_v59, 0.0  ;;  %v403_v62 = vsel %vm402_vm13, %v394_v60, 0.0 }
  0x8a   : > { %v411_v63 = vrot.slane %v410_v61, 4  ;;  %v404_v0 = vrot.slane %v403_v62, 4  ;;  %v367_v1 = vpop.permute.xlu0 %366  ;;  %v372_v2 = vpop.permute.xlu1 %371 }
  0x8b   : > { %v396_v3 = vmul.f32 %v367_v1, %v312_v56  ;;  %v397_v4 = vmul.f32 %v372_v2, %v312_v56 }
  0x8c   : > { %v412_v5 = vadd.f32 %v411_v63, %v410_v61  ;;  %v405_v6 = vadd.f32 %v404_v0, %v403_v62 }
  0x8d   : > { %v417_v7 = vsel %vm402_vm13, %v396_v3, 0.0  ;;  %v424_v8 = vsel %vm402_vm13, %v397_v4, 0.0 }
  0x8e   : > { %v413_v9 = vrot.slane %v412_v5, 2  ;;  %v406_v10 = vrot.slane %v405_v6, 2  ;;  %v418_v11 = vrot.slane %v417_v7, 4  ;;  %v425_v12 = vrot.slane %v424_v8, 4  ;;  %v377_v13 = vpop.permute.xlu0 %376  ;;  %v382_v14 = vpop.permute.xlu1 %381 }
  0x8f   : > { %v398_v15 = vmul.f32 %v377_v13, %v312_v56  ;;  %v399_v16 = vmul.f32 %v382_v14, %v312_v56 }
  0x90   : > { %v414_v17 = vadd.f32 %v413_v9, %v412_v5  ;;  %v407_v18 = vadd.f32 %v406_v10, %v405_v6  ;;  %v419_v19 = vadd.f32 %v418_v11, %v417_v7  ;;  %v426_v20 = vadd.f32 %v425_v12, %v424_v8 }
  0x91   : > { %v431_v21 = vsel %vm402_vm13, %v398_v15, 0.0  ;;  %v438_v22 = vsel %vm402_vm13, %v399_v16, 0.0 }
  0x92   : > { %v415_v23 = vrot.slane %v414_v17, 1  ;;  %v408_v24 = vrot.slane %v407_v18, 1  ;;  %v420_v27 = vrot.slane %v419_v19, 2  ;;  %v427_v28 = vrot.slane %v426_v20, 2  ;;  %v387_v29 = vpop.permute.xlu0 %386  ;;  %v392_v30 = vpop.permute.xlu1 %391 }
  0x93   : > { %v432_v36 = vrot.slane %v431_v21, 4  ;;  %v439_v37 = vrot.slane %v438_v22, 4  ;;  %v400_v38 = vmul.f32 %v387_v29, %v312_v56  ;;  %v401_v39 = vmul.f32 %v392_v30, %v312_v56 }
  0x94   : > { %v416_v40 = vadd.f32 %v415_v23, %v414_v17  ;;  %v421_v41 = vadd.f32 %v420_v27, %v419_v19  ;;  %v428_v42 = vadd.f32 %v427_v28, %v426_v20  ;;  %v409_v52 = vadd.f32 %v408_v24, %v407_v18 }
  0x95   : > { %v433_v43 = vadd.f32 %v432_v36, %v431_v21  ;;  %v440_v44 = vadd.f32 %v439_v37, %v438_v22  ;;  %v445_v45 = vsel %vm402_vm13, %v400_v38, 0.0  ;;  %v452_v46 = vsel %vm402_vm13, %v401_v39, 0.0 }
  0x96   : > { %v422_v47 = vrot.slane %v421_v41, 1  ;;  %v429_v48 = vrot.slane %v428_v42, 1  ;;  %v446_v49 = vrot.slane %v445_v45, 4  ;;  %v453_v50 = vrot.slane %v452_v46, 4  ;;  %v463_v51 = vpop.permute.xlu0 %462  ;;  %v674_v26 = vpop.permute.xlu1 %673 }
  0x97   : > { %v434_v53 = vrot.slane %v433_v43, 2  ;;  %v441_v54 = vrot.slane %v440_v44, 2  ;;  %v464_v55 = vrot.slane %v463_v51, 1  ;;  %v465_v59 = vrot.slane %v463_v51, 2 }
  0x98   : > { %v423_v56 = vadd.f32 %v422_v47, %v421_v41  ;;  %v447_v57 = vadd.f32 %v446_v49, %v445_v45  ;;  %v454_v58 = vadd.f32 %v453_v50, %v452_v46  ;;  %v430_v60 = vadd.f32 %v429_v48, %v428_v42 }
  0x99   : > { %v435_v61 = vadd.f32 %v434_v53, %v433_v43  ;;  %v442_v62 = vadd.f32 %v441_v54, %v440_v44  ;;  %v466_v63 = vrot.slane %v463_v51, 3  ;;  %v1939_v2 = vadd.f32 %v464_v55, %v416_v40 }
  0x9a   : > { %v448_v0 = vrot.slane %v447_v57, 2  ;;  %v455_v1 = vrot.slane %v454_v58, 2  ;;  %v1941_v5 = vadd.f32 %v463_v51, %v409_v52  ;;  %v467_v6 = vrot.slane %v463_v51, 4  ;;  %v680_v32 = vpop.permute.xlu0 %679  ;;  %v688_v50 = vpop.permute.xlu1 %687 }
  0x9b   : > { %v436_v3 = vrot.slane %v435_v61, 1  ;;  %v443_v4 = vrot.slane %v442_v62, 1  ;;  %v468_v9 = vrot.slane %v463_v51, 5  ;;  %v1943_v10 = vadd.f32 %v465_v59, %v423_v56 }
  0x9c   : > { %v449_v7 = vadd.f32 %v448_v0, %v447_v57  ;;  %v456_v8 = vadd.f32 %v455_v1, %v454_v58  ;;  %v1945_v13 = vadd.f32 %v466_v63, %v430_v60  ;;  %v507_v14 = vrot.slane %v1939_v2, 7 }
  0x9d   : > { %v437_v11 = vadd.f32 %v436_v3, %v435_v61  ;;  %v444_v12 = vadd.f32 %v443_v4, %v442_v62  ;;  %v469_v17 = vrot.slane %v463_v51, 6  ;;  %v510_v18 = vrot.slane %v1943_v10, 6 }
  0x9e   : > { %v450_v15 = vrot.slane %v449_v7, 1  ;;  %v457_v16 = vrot.slane %v456_v8, 1  ;;  %v509_v21 = vsel %vm508_vm14, %v507_v14, %v1941_v5  ;;  %v513_v22 = vrot.slane %v1945_v13, 5  ;;  %v695_v53 = vpop.permute.xlu0 %694  ;;  %v2000_v0 = vpop.permute.xlu1 %772 }
  0x9f   : > { %v483_v19 = vadd.f32 %v467_v6, %v437_v11  ;;  %v484_v20 = vadd.f32 %v468_v9, %v444_v12  ;;  %v470_v27 = vrot.slane %v463_v51, 7  ;;  %v512_v28 = vsel %vm511_vm15, %v510_v18, %v509_v21 }
  0xa0   : > { %v451_v23 = vadd.f32 %v450_v15, %v449_v7  ;;  %v458_v24 = vadd.f32 %v457_v16, %v456_v8  ;;  %v515_v38 = vsel %vm514_vm0, %v513_v22, %v512_v28 }
  0xa1   : > { %v516_v29 = vrot.slane %v483_v19, 4  ;;  %v519_v30 = vrot.slane %v484_v20, 3 }
  0xa2   : > { %v485_v36 = vadd.f32 %v469_v17, %v451_v23  ;;  %v486_v37 = vadd.f32 %v470_v27, %v458_v24  ;;  %v2008_v12 = vpop.permute.xlu1 %820 }
  0xa3   : > { %v518_v39 = vsel %vm517_vm1, %v516_v29, %v515_v38 }
  0xa4   : > { %v522_v40 = vrot.slane %v485_v36, 2  ;;  %v525_v41 = vrot.slane %v486_v37, 1  ;;  %v521_v42 = vsel %vm520_vm2, %v519_v30, %v518_v39 }
  0xa6   : > { %v524_v43 = vsel %vm523_vm3, %v522_v40, %v521_v42  ;;  %v2012_v15 = vpop.permute.xlu1 %815 }
  0xa7   : > { %v527_v44 = vsel %vm526_vm6, %v525_v41, %v524_v43 }
  0xa8   : > { %1591 = vmatmul.mubr.msk.f32.vlgmr.msra.gmra.mrb[0].mxu0 %vm528_vm7, %v527_v44  ;;  %1602 = vmatmul.mubr.msk.f32.vlgmr.msra.gmra.mrb[0].mxu1 %vm528_vm7, %v527_v44  ;;  %v683_v47 = vmul.f32 %v680_v32, %v527_v44 }
  0xa9   : > { %1640 = vmatpush3.bf16.msk.msra.mxu0 %vm1819_vm4, %v1707_v31  ;;  %1646 = vmatpush3.bf16.msk.msra.mxu1 %vm1832_vm5, %v1707_v31 }
  0xaa   : > { %1641 = vmatprep.subr.bf16.mxu0 %v1706_v25  ;;  %1647 = vmatprep.subr.bf16.mxu1 %v1706_v25  ;;  %v836_v39 = vpop.permute.xlu1 %835 }
  0xab   : > { %1612 = vmatprep.mubr.msk.f32.mxu0 %vm1708_vm11, %v1709_v34  ;;  %1623 = vmatprep.mubr.msk.f32.mxu1 %vm1708_vm11, %v1709_v34 }
  0xad   : > { %1643 = vmatpush3.bf16.msk.msra.mxu0 %vm1841_vm9, %v1707_v31  ;;  %1649 = vmatpush3.bf16.msk.msra.mxu1 %vm1847_vm12, %v1707_v31 }
 0x17b   : > { %v597_v45 = vpop.f32.mrb[0].mxu0  ;;  %v667_v46 = vpop.f32.mrb[0].mxu1 }
 0x17c   : > { %v676_v25 = vmul.f32 %v674_v26, %v597_v45  ;;  %v1592_v48 = vpop.f32.mrb[1].mxu0  ;;  %v1603_v49 = vpop.f32.mrb[1].mxu1  ;;  %v690_v52 = vmul.f32 %v688_v50, %v667_v46 }
 0x17e   : > { %v684_v51 = vadd.f32 %v683_v47, %v676_v25 }
 0x180   : > { %v691_v34 = vadd.f32 %v690_v52, %v684_v51 }
 0x182   : > { %v1978_v54 = vadd.f32 %v695_v53, %v691_v34 }
 0x184   : > { %v699_v33 = vrot.slane %v1978_v54, 1  ;;  %v700_v35 = vrot.slane %v1978_v54, 2  ;;  %v701_v31 = vrot.slane %v1978_v54, 3  ;;  %v702_v55 = vrot.slane %v1978_v54, 4 }
 0x185   : > { %v703_v56 = vrot.slane %v1978_v54, 5  ;;  %v704_v57 = vrot.slane %v1978_v54, 6  ;;  %v705_v58 = vrot.slane %v1978_v54, 7  ;;  %v714_v59 = vsub.f32 %v1941_v5, %v1978_v54 }
 0x186   : > { %v715_v60 = vsub.f32 %v1939_v2, %v699_v33  ;;  %v716_v61 = vsub.f32 %v1943_v10, %v700_v35  ;;  %v717_v62 = vsub.f32 %v1945_v13, %v701_v31  ;;  %v718_v63 = vsub.f32 %v483_v19, %v702_v55  ;;  %v2010_v13 = vpop.permute.xlu0 %801 }
 0x187   : > { %v719_v1 = vsub.f32 %v484_v20, %v703_v56  ;;  %v720_v3 = vsub.f32 %v485_v36, %v704_v57  ;;  %v722_v2 = vmul.f32 0.5, %v714_v59  ;;  %v721_v4 = vsub.f32 %v486_v37, %v705_v58 }
 0x188   : > { %v723_v5 = vmul.f32 0.5, %v715_v60  ;;  %v724_v6 = vmul.f32 0.5, %v716_v61  ;;  %v725_v7 = vmul.f32 0.5, %v717_v62  ;;  %v726_v8 = vmul.f32 0.5, %v718_v63 }
 0x189   : > { %1665 = vtanh.f32 %v722_v2  ;;  %v727_v9 = vmul.f32 0.5, %v719_v1  ;;  %v728_v10 = vmul.f32 0.5, %v720_v3  ;;  %v729_v11 = vmul.f32 0.5, %v721_v4 }
 0x18a   : > { %1667 = vtanh.f32 %v723_v5  ;;  %v826_v29 = vpop.permute.xlu0 %825 }
 0x18b   : > { %1669 = vtanh.f32 %v724_v6 }
 0x18c   : > { %1671 = vtanh.f32 %v725_v7 }
 0x18d   : > { %1673 = vtanh.f32 %v726_v8 }
 0x18e   : > { %1675 = vtanh.f32 %v727_v9 }
 0x18f   : > { %1677 = vtanh.f32 %v728_v10 }
 0x190   : > { %1679 = vtanh.f32 %v729_v11 }
 0x193   : > { %v1666_v14 = vpop.eup %1665 }
 0x194   : > { %v1668_v16 = vpop.eup %1667  ;;  %v738_v17 = vadd.f32 1.0, %v1666_v14 }
 0x195   : > { %v1670_v18 = vpop.eup %1669  ;;  %v739_v19 = vadd.f32 1.0, %v1668_v16 }
 0x196   : > { %v1672_v20 = vpop.eup %1671  ;;  %v740_v21 = vadd.f32 1.0, %v1670_v18  ;;  %v746_v22 = vmul.f32 0.5, %v738_v17 }
 0x197   : > { %v1674_v23 = vpop.eup %1673  ;;  %v741_v24 = vadd.f32 1.0, %v1672_v20  ;;  %v747_v27 = vmul.f32 0.5, %v739_v19 }
 0x198   : > { %v1676_v28 = vpop.eup %1675  ;;  %v742_v30 = vadd.f32 1.0, %v1674_v23  ;;  %v748_v36 = vmul.f32 0.5, %v740_v21  ;;  %v754_v37 = vmul.f32 %v746_v22, %v714_v59 }
 0x199   : > { %v1678_v38 = vpop.eup %1677  ;;  %v743_v40 = vadd.f32 1.0, %v1676_v28  ;;  %v749_v41 = vmul.f32 0.5, %v741_v24  ;;  %v755_v42 = vmul.f32 %v747_v27, %v715_v60  ;;  %v831_v60 = vpop.permute.xlu0 %830 }
 0x19a   : > { %v1680_v43 = vpop.eup %1679  ;;  %v744_v44 = vadd.f32 1.0, %v1678_v38  ;;  %v750_v26 = vmul.f32 0.5, %v742_v30  ;;  %v756_v32 = vmul.f32 %v748_v36, %v716_v61  ;;  %v762_v50 = vadd.f32 %v754_v37, %v1978_v54 }
 0x19b   : > { %v745_v45 = vadd.f32 1.0, %v1680_v43  ;;  %v751_v46 = vmul.f32 0.5, %v743_v40  ;;  %v757_v47 = vmul.f32 %v749_v41, %v717_v62  ;;  %v763_v25 = vadd.f32 %v755_v42, %v699_v33  ;;  %v846_v33 = vpop.permute.xlu1 %845 }
 0x19c   : > { %v752_v48 = vmul.f32 0.5, %v744_v44  ;;  %v758_v49 = vmul.f32 %v750_v26, %v718_v63  ;;  %v764_v51 = vadd.f32 %v756_v32, %v700_v35 }
 0x19d   : > { %v753_v52 = vmul.f32 0.5, %v745_v45  ;;  %v759_v34 = vmul.f32 %v751_v46, %v719_v1  ;;  %v765_v53 = vadd.f32 %v757_v47, %v701_v31  ;;  %v783_v59 = vrot.slane %v763_v25, 7  ;;  %v841_v11 = vpop.permute.xlu0 %840 }
 0x19e   : > { %v760_v61 = vmul.f32 %v752_v48, %v720_v3  ;;  %v766_v62 = vadd.f32 %v758_v49, %v702_v55  ;;  %v785_v2 = vrot.slane %v764_v51, 6 }
 0x19f   : > { %v761_v5 = vmul.f32 %v753_v52, %v721_v4  ;;  %v767_v63 = vadd.f32 %v759_v34, %v703_v56  ;;  %v784_v6 = vsel %vm508_vm14, %v783_v59, %v762_v50  ;;  %v787_v35 = vrot.slane %v765_v53, 5  ;;  %v2035_v16 = vpop.permute.xlu1 %921 }
 0x1a0   : > { %v768_v1 = vadd.f32 %v760_v61, %v704_v57  ;;  %v786_v31 = vsel %vm511_vm15, %v785_v2, %v784_v6  ;;  %v789_v7 = vrot.slane %v766_v62, 4  ;;  %v923_v54 = vrot.slane %v2035_v16, 1 }
 0x1a1   : > { %v769_v3 = vadd.f32 %v761_v5, %v705_v58  ;;  %v788_v55 = vsel %vm514_vm0, %v787_v35, %v786_v31  ;;  %v791_v8 = vrot.slane %v767_v63, 3  ;;  %v924_v18 = vrot.slane %v2035_v16, 2  ;;  %v851_v22 = vpop.permute.xlu0 %850 }
 0x1a2   : > { %v790_v4 = vsel %vm517_vm1, %v789_v7, %v788_v55  ;;  %v793_v9 = vrot.slane %v768_v1, 2  ;;  %v925_v19 = vrot.slane %v2035_v16, 3  ;;  %v926_v20 = vrot.slane %v2035_v16, 4 }
 0x1a3   : > { %v792_v56 = vsel %vm520_vm2, %v791_v8, %v790_v4  ;;  %v795_v10 = vrot.slane %v769_v3, 1  ;;  %v927_v21 = vrot.slane %v2035_v16, 5 }
 0x1a4   : > { %v794_v14 = vsel %vm523_vm3, %v793_v9, %v792_v56 }
 0x1a5   : > { %v796_v57 = vsel %vm526_vm6, %v795_v10, %v794_v14 }
 0x1a6   : > { %v798_v17 = vmul.f32 %v796_v57, %v2000_v0 }
 0x1a8   : > { %v804_v58 = vadd.f32 %v2010_v13, %v798_v17 }
 0x1aa   : > { %v853_v23 = vmul.f32 %v2012_v15, %v804_v58  ;;  %v854_v24 = vmul.f32 %v2008_v12, %v804_v58  ;;  %v855_v27 = vmul.f32 %v826_v29, %v804_v58  ;;  %v856_v28 = vmul.f32 %v831_v60, %v804_v58 }
 0x1ab   : > { %v857_v0 = vmul.f32 %v836_v39, %v804_v58  ;;  %v858_v30 = vmul.f32 %v841_v11, %v804_v58  ;;  %v859_v36 = vmul.f32 %v846_v33, %v804_v58  ;;  %v860_v37 = vmul.f32 %v851_v22, %v804_v58 }
 0x1ac   : > { %v861_v13 = vsel %vm528_vm7, %v853_v23, 0.0  ;;  %v868_v38 = vsel %vm528_vm7, %v854_v24, 0.0  ;;  %v875_v40 = vsel %vm528_vm7, %v855_v27, 0.0  ;;  %v882_v41 = vsel %vm528_vm7, %v856_v28, 0.0 }
 0x1ad   : > { %v862_v42 = vrot.slane %v861_v13, 4  ;;  %v869_v43 = vrot.slane %v868_v38, 4  ;;  %v876_v44 = vrot.slane %v875_v40, 4  ;;  %v883_v15 = vrot.slane %v882_v41, 4 }
 0x1ae   : > { %v889_v12 = vsel %vm528_vm7, %v857_v0, 0.0  ;;  %v896_v29 = vsel %vm528_vm7, %v858_v30, 0.0  ;;  %v903_v39 = vsel %vm528_vm7, %v859_v36, 0.0  ;;  %v910_v26 = vsel %vm528_vm7, %v860_v37, 0.0 }
 0x1af   : > { %v863_v32 = vadd.f32 %v862_v42, %v861_v13  ;;  %v870_v45 = vadd.f32 %v869_v43, %v868_v38  ;;  %v877_v46 = vadd.f32 %v876_v44, %v875_v40  ;;  %v884_v47 = vadd.f32 %v883_v15, %v882_v41 }
 0x1b0   : > { %v890_v25 = vrot.slane %v889_v12, 4  ;;  %v897_v48 = vrot.slane %v896_v29, 4  ;;  %v904_v49 = vrot.slane %v903_v39, 4  ;;  %v911_v50 = vrot.slane %v910_v26, 4 }
 0x1b1   : > { %v864_v51 = vrot.slane %v863_v32, 2  ;;  %v871_v52 = vrot.slane %v870_v45, 2  ;;  %v878_v34 = vrot.slane %v877_v46, 2  ;;  %v885_v53 = vrot.slane %v884_v47, 2 }
 0x1b2   : > { %v891_v59 = vadd.f32 %v890_v25, %v889_v12  ;;  %v898_v60 = vadd.f32 %v897_v48, %v896_v29  ;;  %v905_v61 = vadd.f32 %v904_v49, %v903_v39  ;;  %v912_v62 = vadd.f32 %v911_v50, %v910_v26  ;;  %v1125_v25 = vpop.permute.xlu0 %1124  ;;  %v1131_v48 = vpop.permute.xlu1 %1130 }
 0x1b3   : > { %v865_v2 = vadd.f32 %v864_v51, %v863_v32  ;;  %v872_v33 = vadd.f32 %v871_v52, %v870_v45  ;;  %v879_v5 = vadd.f32 %v878_v34, %v877_v46  ;;  %v886_v63 = vadd.f32 %v885_v53, %v884_v47 }
 0x1b4   : > { %v892_v6 = vrot.slane %v891_v59, 2  ;;  %v899_v35 = vrot.slane %v898_v60, 2  ;;  %v906_v1 = vrot.slane %v905_v61, 2  ;;  %v913_v31 = vrot.slane %v912_v62, 2 }
 0x1b5   : > { %v866_v7 = vrot.slane %v865_v2, 1  ;;  %v873_v3 = vrot.slane %v872_v33, 1  ;;  %v880_v55 = vrot.slane %v879_v5, 1  ;;  %v887_v8 = vrot.slane %v886_v63, 1 }
 0x1b6   : > { %v893_v4 = vadd.f32 %v892_v6, %v891_v59  ;;  %v900_v9 = vadd.f32 %v899_v35, %v898_v60  ;;  %v907_v56 = vadd.f32 %v906_v1, %v905_v61  ;;  %v914_v10 = vadd.f32 %v913_v31, %v912_v62  ;;  %v1139_v59 = vpop.permute.xlu0 %1138 }
 0x1b7   : > { %v867_v11 = vadd.f32 %v866_v7, %v865_v2  ;;  %v874_v14 = vadd.f32 %v873_v3, %v872_v33  ;;  %v881_v57 = vadd.f32 %v880_v55, %v879_v5  ;;  %v888_v17 = vadd.f32 %v887_v8, %v886_v63  ;;  %v1146_v2 = vpop.permute.xlu1 %1145 }
 0x1b8   : > { %v894_v58 = vrot.slane %v893_v4, 1  ;;  %v901_v22 = vrot.slane %v900_v9, 1  ;;  %v908_v23 = vrot.slane %v907_v56, 1  ;;  %v915_v24 = vrot.slane %v914_v10, 1 }
 0x1b9   : > { %v928_v27 = vrot.slane %v2035_v16, 6  ;;  %v939_v28 = vadd.f32 %v923_v54, %v874_v14  ;;  %v940_v0 = vadd.f32 %v924_v18, %v881_v57  ;;  %v941_v30 = vadd.f32 %v925_v19, %v888_v17 }
 0x1ba   : > { %v895_v36 = vadd.f32 %v894_v58, %v893_v4  ;;  %v902_v37 = vadd.f32 %v901_v22, %v900_v9  ;;  %v909_v13 = vadd.f32 %v908_v23, %v907_v56  ;;  %v916_v38 = vadd.f32 %v915_v24, %v914_v10  ;;  %v2095_v56 = vpop.permute.xlu0 %1223 }
 0x1bb   : > { %v929_v40 = vrot.slane %v2035_v16, 7  ;;  %v938_v41 = vadd.f32 %v2035_v16, %v867_v11  ;;  %v966_v42 = vrot.slane %v939_v28, 7  ;;  %v968_v43 = vrot.slane %v940_v0, 6  ;;  %v2101_v57 = vpop.permute.xlu1 %1252 }
 0x1bc   : > { %v942_v44 = vadd.f32 %v926_v20, %v895_v36  ;;  %v943_v54 = vadd.f32 %v927_v21, %v902_v37  ;;  %v944_v18 = vadd.f32 %v928_v27, %v909_v13  ;;  %v970_v12 = vrot.slane %v941_v30, 5 }
 0x1bd   : > { %v945_v15 = vadd.f32 %v929_v40, %v916_v38  ;;  %v967_v19 = vsel %vm508_vm14, %v966_v42, %v938_v41 }
 0x1be   : > { %v969_v29 = vsel %vm511_vm15, %v968_v43, %v967_v19  ;;  %v972_v39 = vrot.slane %v942_v44, 4  ;;  %v974_v32 = vrot.slane %v943_v54, 3  ;;  %v976_v46 = vrot.slane %v944_v18, 2 }
 0x1bf   : > { %v971_v26 = vsel %vm514_vm0, %v970_v12, %v969_v29  ;;  %v978_v20 = vrot.slane %v945_v15, 1  ;;  %v2107_v36 = vpop.permute.xlu1 %1351 }
 0x1c0   : > { %v973_v45 = vsel %vm517_vm1, %v972_v39, %v971_v26 }
 0x1c1   : > { %v975_v47 = vsel %vm520_vm2, %v974_v32, %v973_v45 }
 0x1c2   : > { %v977_v16 = vsel %vm523_vm3, %v976_v46, %v975_v47 }
 0x1c3   : > { %v979_v21 = vsel %vm526_vm6, %v978_v20, %v977_v16  ;;  %v2111_v40 = vpop.permute.xlu1 %1356 }
 0x1c4   : > { %1613 = vmatmul.mubr.msk.f32.vlgmr.msra.gmra.mrb[2].mxu0 %vm528_vm7, %v979_v21  ;;  %1624 = vmatmul.mubr.msk.f32.vlgmr.msra.gmra.mrb[2].mxu1 %vm528_vm7, %v979_v21  ;;  %v1134_v52 = vmul.f32 %v1131_v48, %v979_v21 }
 0x297   : > { %v1048_v49 = vpop.f32.mrb[2].mxu0  ;;  %v1118_v50 = vpop.f32.mrb[2].mxu1 }
 0x298   : > { %v1127_v51 = vmul.f32 %v1125_v25, %v1048_v49  ;;  %v1614_v34 = vpop.f32.mrb[3].mxu0  ;;  %v1625_v53 = vpop.f32.mrb[3].mxu1  ;;  %v1141_v61 = vmul.f32 %v1139_v59, %v1118_v50 }
 0x299   : > { %v1278_v25 = vpop.permute.xlu1 %1277 }
 0x29a   : > { %v1135_v60 = vadd.f32 %v1134_v52, %v1127_v51 }
 0x29c   : > { %v1142_v62 = vadd.f32 %v1141_v61, %v1135_v60 }
 0x29e   : > { %v2077_v33 = vadd.f32 %v1146_v2, %v1142_v62 }
 0x2a0   : > { %v1150_v5 = vrot.slane %v2077_v33, 1  ;;  %v1151_v63 = vrot.slane %v2077_v33, 2  ;;  %v1152_v6 = vrot.slane %v2077_v33, 3  ;;  %v1153_v35 = vrot.slane %v2077_v33, 4 }
 0x2a1   : > { %v1154_v1 = vrot.slane %v2077_v33, 5  ;;  %v1155_v31 = vrot.slane %v2077_v33, 6  ;;  %v1156_v7 = vrot.slane %v2077_v33, 7  ;;  %v1165_v3 = vsub.f32 %v938_v41, %v2077_v33 }
 0x2a2   : > { %v1166_v55 = vsub.f32 %v939_v28, %v1150_v5  ;;  %v1167_v8 = vsub.f32 %v940_v0, %v1151_v63  ;;  %v1168_v4 = vsub.f32 %v941_v30, %v1152_v6  ;;  %v1169_v9 = vsub.f32 %v942_v44, %v1153_v35  ;;  %v2105_v30 = vpop.permute.xlu0 %1267 }
 0x2a3   : > { %v1170_v10 = vsub.f32 %v943_v54, %v1154_v1  ;;  %v1171_v11 = vsub.f32 %v944_v18, %v1155_v31  ;;  %v1173_v14 = vmul.f32 0.5, %v1165_v3  ;;  %v1172_v17 = vsub.f32 %v945_v15, %v1156_v7 }
 0x2a4   : > { %v1174_v58 = vmul.f32 0.5, %v1166_v55  ;;  %v1175_v22 = vmul.f32 0.5, %v1167_v8  ;;  %v1176_v23 = vmul.f32 0.5, %v1168_v4  ;;  %v1177_v24 = vmul.f32 0.5, %v1169_v9 }
 0x2a5   : > { %1681 = vtanh.f32 %v1173_v14  ;;  %v1178_v27 = vmul.f32 0.5, %v1170_v10  ;;  %v1179_v28 = vmul.f32 0.5, %v1171_v11  ;;  %v1180_v0 = vmul.f32 0.5, %v1172_v17 }
 0x2a6   : > { %1683 = vtanh.f32 %v1174_v58  ;;  %v2109_v13 = vpop.permute.xlu0 %1272 }
 0x2a7   : > { %1685 = vtanh.f32 %v1175_v22 }
 0x2a8   : > { %1687 = vtanh.f32 %v1176_v23 }
 0x2a9   : > { %1689 = vtanh.f32 %v1177_v24 }
 0x2aa   : > { %1691 = vtanh.f32 %v1178_v27  ;;  %v1263_v46 = vpop.permute.xlu0 %1262 }
 0x2ab   : > { %1693 = vtanh.f32 %v1179_v28 }
 0x2ac   : > { %1695 = vtanh.f32 %v1180_v0 }
 0x2ae   : > { %v1347_v22 = vpop.permute.xlu0 %1346 }
 0x2af   : > { %v1682_v37 = vpop.eup %1681 }
 0x2b0   : > { %v1684_v38 = vpop.eup %1683  ;;  %v1189_v41 = vadd.f32 1.0, %v1682_v37 }
 0x2b1   : > { %v1686_v42 = vpop.eup %1685  ;;  %v1190_v43 = vadd.f32 1.0, %v1684_v38 }
 0x2b2   : > { %v1688_v44 = vpop.eup %1687  ;;  %v1191_v54 = vadd.f32 1.0, %v1686_v42  ;;  %v1197_v18 = vmul.f32 0.5, %v1189_v41  ;;  %v2134_v41 = vpop.permute.xlu0 %1315 }
 0x2b3   : > { %v1690_v15 = vpop.eup %1689  ;;  %v1192_v19 = vadd.f32 1.0, %v1688_v44  ;;  %v1198_v12 = vmul.f32 0.5, %v1190_v43  ;;  %v1318_v44 = vrot.slane %v2134_v41, 2 }
 0x2b4   : > { %v1692_v29 = vpop.eup %1691  ;;  %v1193_v39 = vadd.f32 1.0, %v1690_v15  ;;  %v1199_v26 = vmul.f32 0.5, %v1191_v54  ;;  %v1205_v32 = vmul.f32 %v1197_v18, %v1165_v3  ;;  %v1319_v54 = vrot.slane %v2134_v41, 3 }
 0x2b5   : > { %v1694_v45 = vpop.eup %1693  ;;  %v1194_v47 = vadd.f32 1.0, %v1692_v29  ;;  %v1200_v20 = vmul.f32 0.5, %v1192_v19  ;;  %v1206_v16 = vmul.f32 %v1198_v12, %v1166_v55 }
 0x2b6   : > { %v1696_v21 = vpop.eup %1695  ;;  %v1195_v48 = vadd.f32 1.0, %v1694_v45  ;;  %v1201_v49 = vmul.f32 0.5, %v1193_v39  ;;  %v1207_v50 = vmul.f32 %v1199_v26, %v1167_v8  ;;  %v1213_v61 = vadd.f32 %v1205_v32, %v2077_v33 }
 0x2b7   : > { %v1196_v51 = vadd.f32 1.0, %v1696_v21  ;;  %v1202_v52 = vmul.f32 0.5, %v1194_v47  ;;  %v1208_v34 = vmul.f32 %v1200_v20, %v1168_v4  ;;  %v1214_v53 = vadd.f32 %v1206_v16, %v1150_v5 }
 0x2b8   : > { %v1203_v59 = vmul.f32 0.5, %v1195_v48  ;;  %v1209_v60 = vmul.f32 %v1201_v49, %v1169_v9  ;;  %v1215_v62 = vadd.f32 %v1207_v50, %v1151_v63  ;;  %v1362_v63 = vpop.permute.xlu1 %1361 }
 0x2b9   : > { %v1204_v2 = vmul.f32 0.5, %v1196_v51  ;;  %v1210_v3 = vmul.f32 %v1202_v52, %v1170_v10  ;;  %v1216_v55 = vadd.f32 %v1208_v34, %v1152_v6  ;;  %v1234_v14 = vrot.slane %v1214_v53, 7 }
 0x2ba   : > { %v1211_v8 = vmul.f32 %v1203_v59, %v1171_v11  ;;  %v1217_v4 = vadd.f32 %v1209_v60, %v1153_v35  ;;  %v1236_v58 = vrot.slane %v1215_v62, 6 }
 0x2bb   : > { %v1212_v5 = vmul.f32 %v1204_v2, %v1172_v17  ;;  %v1218_v9 = vadd.f32 %v1210_v3, %v1154_v1  ;;  %v1235_v23 = vsel %vm508_vm14, %v1234_v14, %v1213_v61  ;;  %v1238_v24 = vrot.slane %v1216_v55, 5 }
 0x2bc   : > { %v1219_v10 = vadd.f32 %v1211_v8, %v1155_v31  ;;  %v1237_v6 = vsel %vm511_vm15, %v1236_v58, %v1235_v23  ;;  %v1240_v27 = vrot.slane %v1217_v4, 4  ;;  %v2137_v42 = vpop.permute.xlu1 %1400 }
 0x2bd   : > { %v1220_v11 = vadd.f32 %v1212_v5, %v1156_v7  ;;  %v1239_v35 = vsel %vm514_vm0, %v1238_v24, %v1237_v6  ;;  %v1242_v28 = vrot.slane %v1218_v9, 3  ;;  %v1317_v7 = vrot.slane %v2134_v41, 1 }
 0x2be   : > { %v1241_v17 = vsel %vm517_vm1, %v1240_v27, %v1239_v35  ;;  %v1244_v0 = vrot.slane %v1219_v10, 2  ;;  %v1402_v18 = vrot.slane %v2137_v42, 1  ;;  %v1403_v15 = vrot.slane %v2137_v42, 2 }
 0x2bf   : > { %v1243_v1 = vsel %vm520_vm2, %v1242_v28, %v1241_v17  ;;  %v1246_v37 = vrot.slane %v1220_v11, 1 }
 0x2c0   : > { %v1245_v38 = vsel %vm523_vm3, %v1244_v0, %v1243_v1 }
 0x2c1   : > { %v1247_v31 = vsel %vm526_vm6, %v1246_v37, %v1245_v38 }
 0x2c2   : > { %v1249_v33 = vmul.f32 %v1247_v31, %v2095_v56 }
 0x2c4   : > { %v1255_v43 = vadd.f32 %v2101_v57, %v1249_v33 }
 0x2c6   : > { %v1280_v19 = vmul.f32 %v1263_v46, %v1255_v43  ;;  %v1281_v12 = vmul.f32 %v2105_v30, %v1255_v43  ;;  %v1282_v29 = vmul.f32 %v2109_v13, %v1255_v43  ;;  %v1283_v39 = vmul.f32 %v1278_v25, %v1255_v43 }
 0x2c7   : > { %v1364_v26 = vmul.f32 %v1347_v22, %v1255_v43  ;;  %v1365_v56 = vmul.f32 %v2107_v36, %v1255_v43  ;;  %v1366_v32 = vmul.f32 %v2111_v40, %v1255_v43  ;;  %v1367_v57 = vmul.f32 %v1362_v63, %v1255_v43 }
 0x2c8   : > { %v1284_v45 = vsel %vm528_vm7, %v1280_v19, 0.0  ;;  %v1291_v47 = vsel %vm528_vm7, %v1281_v12, 0.0  ;;  %v1298_v20 = vsel %vm528_vm7, %v1282_v29, 0.0  ;;  %v1305_v16 = vsel %vm528_vm7, %v1283_v39, 0.0 }
 0x2c9   : > { %v1285_v46 = vrot.slane %v1284_v45, 4  ;;  %v1292_v21 = vrot.slane %v1291_v47, 4  ;;  %v1299_v30 = vrot.slane %v1298_v20, 4  ;;  %v1306_v48 = vrot.slane %v1305_v16, 4 }
 0x2ca   : > { %v1368_v13 = vsel %vm528_vm7, %v1364_v26, 0.0  ;;  %v1375_v25 = vsel %vm528_vm7, %v1365_v56, 0.0  ;;  %v1382_v36 = vsel %vm528_vm7, %v1366_v32, 0.0  ;;  %v1389_v40 = vsel %vm528_vm7, %v1367_v57, 0.0 }
 0x2cb   : > { %v1286_v49 = vadd.f32 %v1285_v46, %v1284_v45  ;;  %v1293_v50 = vadd.f32 %v1292_v21, %v1291_v47  ;;  %v1300_v51 = vadd.f32 %v1299_v30, %v1298_v20  ;;  %v1307_v52 = vadd.f32 %v1306_v48, %v1305_v16 }
 0x2cc   : > { %v1369_v34 = vrot.slane %v1368_v13, 4  ;;  %v1376_v53 = vrot.slane %v1375_v25, 4  ;;  %v1383_v59 = vrot.slane %v1382_v36, 4  ;;  %v1390_v60 = vrot.slane %v1389_v40, 4 }
 0x2cd   : > { %v1287_v61 = vrot.slane %v1286_v49, 2  ;;  %v1294_v62 = vrot.slane %v1293_v50, 2  ;;  %v1301_v2 = vrot.slane %v1300_v51, 2  ;;  %v1308_v3 = vrot.slane %v1307_v52, 2 }
 0x2ce   : > { %v1370_v55 = vadd.f32 %v1369_v34, %v1368_v13  ;;  %v1377_v14 = vadd.f32 %v1376_v53, %v1375_v25  ;;  %v1384_v8 = vadd.f32 %v1383_v59, %v1382_v36  ;;  %v1391_v4 = vadd.f32 %v1390_v60, %v1389_v40 }
 0x2cf   : > { %v1288_v58 = vadd.f32 %v1287_v61, %v1286_v49  ;;  %v1295_v22 = vadd.f32 %v1294_v62, %v1293_v50  ;;  %v1302_v5 = vadd.f32 %v1301_v2, %v1300_v51  ;;  %v1309_v9 = vadd.f32 %v1308_v3, %v1307_v52 }
 0x2d0   : > { %v1371_v23 = vrot.slane %v1370_v55, 2  ;;  %v1378_v24 = vrot.slane %v1377_v14, 2  ;;  %v1385_v63 = vrot.slane %v1384_v8, 2  ;;  %v1392_v10 = vrot.slane %v1391_v4, 2 }
 0x2d1   : > { %v1289_v6 = vrot.slane %v1288_v58, 1  ;;  %v1296_v27 = vrot.slane %v1295_v22, 1  ;;  %v1303_v11 = vrot.slane %v1302_v5, 1  ;;  %v1310_v35 = vrot.slane %v1309_v9, 1 }
 0x2d2   : > { %v1372_v28 = vadd.f32 %v1371_v23, %v1370_v55  ;;  %v1379_v17 = vadd.f32 %v1378_v24, %v1377_v14  ;;  %v1386_v0 = vadd.f32 %v1385_v63, %v1384_v8  ;;  %v1393_v1 = vadd.f32 %v1392_v10, %v1391_v4 }
 0x2d3   : > { %v1290_v37 = vadd.f32 %v1289_v6, %v1288_v58  ;;  %v1297_v38 = vadd.f32 %v1296_v27, %v1295_v22  ;;  %v1304_v31 = vadd.f32 %v1303_v11, %v1302_v5  ;;  %v1311_v33 = vadd.f32 %v1310_v35, %v1309_v9 }
 0x2d4   : > { %v1373_v43 = vrot.slane %v1372_v28, 1  ;;  %v1380_v19 = vrot.slane %v1379_v17, 1  ;;  %v1387_v12 = vrot.slane %v1386_v0, 1  ;;  %v1394_v29 = vrot.slane %v1393_v1, 1 }
 0x2d5   : > { %v1404_v39 = vrot.slane %v2137_v42, 3  ;;  %v1325_v26 = vadd.f32 %v1317_v7, %v1297_v38  ;;  %v1326_v56 = vadd.f32 %v1318_v44, %v1304_v31  ;;  %v1327_v32 = vadd.f32 %v1319_v54, %v1311_v33 }
 0x2d6   : > { %v1374_v57 = vadd.f32 %v1373_v43, %v1372_v28  ;;  %v1381_v45 = vadd.f32 %v1380_v19, %v1379_v17  ;;  %v1388_v47 = vadd.f32 %v1387_v12, %v1386_v0  ;;  %v1395_v20 = vadd.f32 %v1394_v29, %v1393_v1 }
 0x2d7   : > { %v1324_v16 = vadd.f32 %v2134_v41, %v1290_v37  ;;  %v1332_v46 = vrot.slane %v1325_v26, 7  ;;  %v1334_v21 = vrot.slane %v1326_v56, 6  ;;  %v1336_v54 = vrot.slane %v1327_v32, 5 }
 0x2d8   : > { %v1410_v30 = vadd.f32 %v1402_v18, %v1381_v45  ;;  %v1411_v7 = vadd.f32 %v1403_v15, %v1388_v47  ;;  %v1412_v48 = vadd.f32 %v1404_v39, %v1395_v20  ;;  %v1409_v41 = vadd.f32 %v2137_v42, %v1374_v57 }
 0x2d9   : > { %v1333_v44 = vsel %vm508_vm14, %v1332_v46, %v1324_v16 }
 0x2da   : > { %v1335_v13 = vsel %vm511_vm15, %v1334_v21, %v1333_v44  ;;  %v1417_v25 = vrot.slane %v1410_v30, 7  ;;  %v1419_v36 = vrot.slane %v1411_v7, 6  ;;  %v1421_v15 = vrot.slane %v1412_v48, 5 }
 0x2db   : > { %v1337_v40 = vsel %vm514_vm0, %v1336_v54, %v1335_v13 }
 0x2dc   : > { %1339 = vst.msk [vmem:[%s307_s12] sm:$0xf] %vm402_vm13, %v1337_v40  ;;  %v1418_v18 = vsel %vm508_vm14, %v1417_v25, %v1409_v41 }
 0x2dd   : > { %v1420_v49 = vsel %vm511_vm15, %v1419_v36, %v1418_v18 }
 0x2de   : > { %v1422_v50 = vsel %vm514_vm0, %v1421_v15, %v1420_v49 }
 0x2df   : > { %1424 = vst.msk [vmem:[%s311_s15] sm:$0xf] %vm402_vm13, %v1422_v50 }
 0x2e0 PF: > { %s19_s27 = sadd.s32 1, %s1703_s27  }
 0x2e1   : > { %p16_p4 = scmp.ge.s32.totalorder %s19_s27, 4  }
 0x2e3   :  { %18 = sbr.rel (!%p16_p4) target bundleno = 1 (0x1), region = 104 }

</bundles_post_ra>
